<compile_context>
chip_gen: v6e
topology: v6e:2x2x1
jax: 0.10.0
libtpu: 0.0.40
codegen_flags: <defaults>
</compile_context>

<pallas_src>
import functools

import numpy as np
import jax
import jax.numpy as jnp
from jax.experimental import pallas as pl
from jax.experimental.pallas import tpu as pltpu


def _pow_int(x, p):
    """x**p for a static positive integer p (exponentiation by squaring)."""
    result = None
    base = x
    while p > 0:
        if p & 1:
            result = base if result is None else result * base
        p >>= 1
        if p:
            base = base * base
    return result


def _round_up(x, m):
    return ((x + m - 1) // m) * m


def _interp_kernel(ref_ref, t_ref, svT_ref, eps_lam_ref, eps_num_ref, rho_ref,
                   scal_ref, o_ref, acc_s_ref, acc_c_ref, *,
                   k_coarse, inv_R, D, use_pow_chain):
    n_idx = pl.program_id(1)

    @pl.when(n_idx == 0)
    def _init():
        acc_s_ref[...] = jnp.zeros_like(acc_s_ref)
        acc_c_ref[...] = jnp.zeros_like(acc_c_ref)

    ref = ref_ref[...]                            # (TR, 1)
    t = t_ref[...]                                # (1, TN) lane-dense
    diff = ref - t                                # (TR, TN)
    d2 = diff * diff
    alpha = scal_ref[0, 0]                        # scalar from SMEM

    # Validity mask is folded into svT in the wrapper -> no tile-wide mask mul here.
    Ks = jnp.exp(-alpha * d2)                     # smooth kernel (one EUP exp)
    k_int = int(k_coarse)
    if use_pow_chain and float(k_coarse) == float(k_int) and k_int >= 1:
        Kc = _pow_int(Ks, k_int)                  # VALU mul chain, no 2nd exp
    else:
        Kc = jnp.exp((-k_coarse) * alpha * d2)    # 2nd EUP exp (v5e / non-integer k)

    # Tiny static svT is the MXU stationary operand; the large per-step K streams.
    svT = svT_ref[...]                            # (TN, 2D+1)
    acc_s_ref[...] += jnp.dot(Ks, svT, preferred_element_type=jnp.float32)
    acc_c_ref[...] += jnp.dot(Kc, svT, preferred_element_type=jnp.float32)

    @pl.when(n_idx == pl.num_programs(1) - 1)
    def _finalize():
        eps_lam = eps_lam_ref[...]                # (1, D)
        eps_num = eps_num_ref[...]                # (1, D)
        acc_s = acc_s_ref[...]                    # (TR, 2D+1)
        acc_c = acc_c_ref[...]

        lam_s = acc_s[:, 0:D] + eps_lam           # un-normalized (1/R cancels below)
        num_s = acc_s[:, D:2 * D] + eps_num
        lam_c = acc_c[:, 0:D] + eps_lam
        num_c = acc_c[:, D:2 * D] + eps_num
        # sum over D of lam_s comes from the valid-indicator column of svT.
        denom = acc_s[:, 2 * D:2 * D + 1] + scal_ref[0, 1]          # (TR, 1)

        cross = jnp.dot(num_s, rho_ref[...], preferred_element_type=jnp.float32)
        cross = cross * pl.reciprocal(denom, approx=True)           # EUP divide
        coarse = num_c * pl.reciprocal(lam_c, approx=True)          # EUP divide

        # Single assembled store: three full (TR, D) planes, no partial sub-tile stores.
        o_ref[...] = jnp.stack([lam_s * inv_R, cross, coarse - cross], axis=0)


def _pick_config():
    """Generation-aware tile sizes / VMEM limit / coarse-kernel strategy."""
    try:
        kind = jax.devices()[0].device_kind.lower()
    except Exception:
        kind = ""
    if "v7" in kind:
        # 64 MiB VMEM per TC, 2 TCs per chip: smaller tiles, keep >=2 parallel R tiles.
        return dict(tile_r=1024, tile_n=1024, vmem=48 * 1024 * 1024,
                    split_r=True, use_pow_chain=True)
    if "v6" in kind:
        return dict(tile_r=2048, tile_n=1024, vmem=96 * 1024 * 1024,
                    split_r=False, use_pow_chain=True)
    if "v5" in kind:
        # v5e: single vst slot -> prefer the second EUP exp over the pow-chain temporaries.
        return dict(tile_r=2048, tile_n=1024, vmem=96 * 1024 * 1024,
                    split_r=False, use_pow_chain=False)
    # Unknown generation: conservative defaults that fit every VMEM budget.
    return dict(tile_r=1024, tile_n=1024, vmem=48 * 1024 * 1024,
                split_r=True, use_pow_chain=True)


def interpolator_forward(S, reference_timesteps, alpha, rho, k=10.0,
                         tile_r=None, tile_n=None):
    """JAX/Pallas equivalent of Interpolator.forward.

    S: (N, 3) float32 [timestep, value, dimension-id]
    reference_timesteps: (1, R) float32
    alpha: (1,) float32 parameter; rho: (D, D) float32 parameter.
    Returns (1, R, 3*D) float32  ==  concat([lam, cross_dim, transient], -1).
    """
    S = S.astype(jnp.float32)
    D = int(rho.shape[0])
    t = S[:, 0]
    v = S[:, 1]
    dims = S[:, 2]
    N = int(t.shape[0])
    R = int(reference_timesteps.shape[1])

    cfg = _pick_config()
    tr = int(tile_r) if tile_r is not None else cfg["tile_r"]
    tn = int(tile_n) if tile_n is not None else cfg["tile_n"]

    r128 = _round_up(R, 128)
    n128 = _round_up(N, 128)
    TR = min(tr, r128)
    TN = min(tn, n128)
    # v7x: make sure the "parallel" R axis has >=2 tiles so both TensorCores get work.
    if cfg["split_r"] and r128 >= 2 * 128:
        TR = min(TR, max(128, _round_up((r128 + 1) // 2, 128)))
    R_pad = _round_up(R, TR)
    N_pad = _round_up(N, TN)

    # Cheap glue in plain JAX: masked one-hot selection & analytic epsilon terms.
    valid = (t > 0.0).astype(jnp.float32)                               # (N,)
    sel = (dims[:, None] == jnp.arange(D, dtype=jnp.float32)[None, :]).astype(jnp.float32)
    vsel = v[:, None] * sel                                             # (N, D)
    # +1e-7 terms use the UN-masked sel/vsel: the reference adds 1e-7 for masked
    # events too and for the prepended zero event.
    n_d = jnp.sum(sel, axis=0)                                          # (D,)
    eps_lam = ((n_d + 1.0) * 1e-07)[None, :]                            # (1, D)
    eps_num = (jnp.sum(vsel, axis=0) * 1e-07)[None, :]                  # (1, D)

    # Validity mask folded into the selection matrix (removes the in-kernel mask mul).
    sel_m = sel * valid[:, None]
    vsel_m = vsel * valid[:, None]
    svT = jnp.zeros((N_pad, 2 * D + 1), jnp.float32)
    svT = svT.at[:N, 0:D].set(sel_m)
    svT = svT.at[:N, D:2 * D].set(vsel_m)
    svT = svT.at[:N, 2 * D].set(valid)                                  # valid-event column

    ref_col = jnp.zeros((R_pad, 1), jnp.float32).at[:R, 0].set(
        reference_timesteps.reshape(-1).astype(jnp.float32))
    t_row = jnp.zeros((1, N_pad), jnp.float32).at[0, :N].set(t)

    rho_f = jnp.asarray(rho, jnp.float32)
    # SMEM scalars: [alpha, sum_d eps_lam_d].
    scalars = jnp.concatenate(
        [jnp.asarray(alpha, jnp.float32).reshape(1),
         jnp.sum(eps_lam).reshape(1)]).reshape(1, 2)

    kernel = functools.partial(
        _interp_kernel, k_coarse=float(k), inv_R=float(1.0 / R), D=D,
        use_pow_chain=cfg["use_pow_chain"])

    grid = (R_pad // TR, N_pad // TN)

    out3 = pl.pallas_call(
        kernel,
        grid=grid,
        in_specs=[
            pl.BlockSpec((TR, 1), lambda r, n: (r, 0)),                 # ref column (fixed per R tile)
            pl.BlockSpec((1, TN), lambda r, n: (0, n)),                 # t row (lane-dense)
            pl.BlockSpec((TN, 2 * D + 1), lambda r, n: (n, 0)),         # svT (MXU stationary)
            pl.BlockSpec((1, D), lambda r, n: (0, 0)),                  # eps_lam
            pl.BlockSpec((1, D), lambda r, n: (0, 0)),                  # eps_num
            pl.BlockSpec((D, D), lambda r, n: (0, 0)),                  # rho
            pl.BlockSpec((1, 2), lambda r, n: (0, 0),
                         memory_space=pltpu.MemorySpace.SMEM),          # [alpha, sum(eps_lam)]
        ],
        out_specs=pl.BlockSpec((3, TR, D), lambda r, n: (0, r, 0)),
        out_shape=jax.ShapeDtypeStruct((3, R_pad, D), jnp.float32),
        scratch_shapes=[
            pltpu.VMEM((TR, 2 * D + 1), jnp.float32),                   # smooth accumulator
            pltpu.VMEM((TR, 2 * D + 1), jnp.float32),                   # coarse accumulator
        ],
        compiler_params=pltpu.CompilerParams(
            dimension_semantics=("parallel", "arbitrary"),
            vmem_limit_bytes=cfg["vmem"]),
    )(ref_col, t_row, svT, eps_lam, eps_num, rho_f, scalars)

    # (3, R, D) -> (R, 3, D) -> (R, 3D) = [lam | cross | transient] per reference row.
    out = jnp.transpose(out3[:, :R, :], (1, 0, 2)).reshape(R, 3 * D)
    return out[None]


def reference_forward_numpy(S, reference_timesteps, alpha, k, rho):
    """Direct numpy translation of the PyTorch forward (per-dimension loop)."""
    S = np.asarray(S, dtype=np.float64)
    ref = np.asarray(reference_timesteps, dtype=np.float64)[0]
    a = float(np.asarray(alpha)[0])
    rho = np.asarray(rho, dtype=np.float64)
    ninp = rho.shape[0]
    R = ref.shape[0]
    timesteps, values, dims = S[:, 0], S[:, 1], S[:, 2]

    def intensity(t_d, aa, reduce):
        d = np.exp(-aa * (ref[:, None] - t_d[None, :]) ** 2)
        m = (t_d > 0).astype(np.float64)
        d = d * m[None, :] + 1e-07
        d = d / R
        return d.sum(1) if reduce else d

    lam = np.zeros((R, ninp))
    smooth = np.zeros((R, ninp))
    coarse = np.zeros((R, ninp))
    for di in range(ninp):
        m = dims == di
        t_d = np.concatenate([[0.0], timesteps[m]])
        v_d = np.concatenate([[0.0], values[m]])
        l_s = intensity(t_d, a, True)
        w_s = intensity(t_d, a, False)
        l_c = intensity(t_d, k * a, True)
        w_c = intensity(t_d, k * a, False)
        lam[:, di] = l_s
        smooth[:, di] = (w_s * v_d[None, :]).sum(1) / l_s
        coarse[:, di] = (w_c * v_d[None, :]).sum(1) / l_c
    cross = (lam * smooth) @ rho / lam.sum(1, keepdims=True)
    transient = coarse - cross
    return np.concatenate([lam, cross, transient], axis=1)[None]


if __name__ == "__main__":
    ninp = 4      # D
    N = 16        # number of events in S
    R = 8         # number of reference timesteps
    k_coarse = 10.0

    key = jax.random.PRNGKey(0)
    k1, k2, k3, k4 = jax.random.split(key, 4)
    t = jax.random.uniform(k1, (N,), minval=0.1, maxval=5.0)
    v = jax.random.normal(k2, (N,))
    d = jax.random.randint(k3, (N,), 0, ninp).astype(jnp.float32)
    S = jnp.stack([t, v, d], axis=1).astype(jnp.float32)
    reference_timesteps = jnp.sort(
        jax.random.uniform(k4, (1, R), minval=0.0, maxval=5.0), axis=1
    ).astype(jnp.float32)

    # Deterministic parameters (as in __init__: alpha=[a], rho=ones(ninp, ninp)).
    alpha = jnp.array([50.0], dtype=jnp.float32)
    rho = jnp.ones((ninp, ninp), dtype=jnp.float32)

    out = interpolator_forward(S, reference_timesteps, alpha, rho, k=k_coarse)
    out = jax.block_until_ready(out)

    ref_out = reference_forward_numpy(np.asarray(S), np.asarray(reference_timesteps),
                                      np.asarray(alpha), k_coarse, np.asarray(rho))
    np.testing.assert_allclose(np.asarray(out), ref_out, rtol=2e-2, atol=2e-2)

    print("KERNEL_OK")
</pallas_src>

<mosaic_0001>
module attributes {stable_mosaic.version = 11 : i64} {
  func.func @_interp_kernel(%arg0: i32, %arg1: i32, %arg2: memref<128x1xf32, #tpu.memory_space<vmem>>, %arg3: memref<1x128xf32, #tpu.memory_space<vmem>>, %arg4: memref<128x9xf32, #tpu.memory_space<vmem>>, %arg5: memref<1x4xf32, #tpu.memory_space<vmem>>, %arg6: memref<1x4xf32, #tpu.memory_space<vmem>>, %arg7: memref<4x4xf32, #tpu.memory_space<vmem>>, %arg8: memref<1x2xf32, #tpu.memory_space<smem>>, %arg9: memref<3x128x4xf32, #tpu.memory_space<vmem>>, %arg10: memref<128x9xf32, #tpu.memory_space<vmem>>, %arg11: memref<128x9xf32, #tpu.memory_space<vmem>>) attributes {dimension_semantics = [#tpu.dimension_semantics<parallel>, #tpu.dimension_semantics<arbitrary>], iteration_bounds = array<i64: 1, 1>, scalar_prefetch = 0 : i64, scratch_operands = 2 : i64, tpu.core_type = #tpu.core_type<tc>, window_params = [{transform_indices = @transform_0, window_bounds = array<i64: 128, 1>}, {transform_indices = @transform_1, window_bounds = array<i64: 1, 128>}, {transform_indices = @transform_2, window_bounds = array<i64: 128, 9>}, {pipeline_mode = #tpu.pipeline_mode<synchronous>, transform_indices = @transform_3, window_bounds = array<i64: 1, 4>}, {pipeline_mode = #tpu.pipeline_mode<synchronous>, transform_indices = @transform_4, window_bounds = array<i64: 1, 4>}, {pipeline_mode = #tpu.pipeline_mode<synchronous>, transform_indices = @transform_5, window_bounds = array<i64: 4, 4>}, {transform_indices = @transform_6, window_bounds = array<i64: 1, 2>}, {transform_indices = @transform_7, window_bounds = array<i64: 3, 128, 4>}]} {
    %c0_i32 = arith.constant 0 : i32
    %0 = arith.cmpi eq, %arg1, %c0_i32 : i32
    %1 = arith.extui %0 : i1 to i32
    %c0_i32_0 = arith.constant 0 : i32
    %2 = arith.cmpi ne, %1, %c0_i32_0 : i32
    scf.if %2 {
      %cst_20 = arith.constant 0.000000e+00 : f32
      %30 = vector.broadcast %cst_20 : f32 to vector<128x9xf32>
      %c0_21 = arith.constant 0 : index
      %c0_22 = arith.constant 0 : index
      %31 = vector.load %arg10[%c0_21, %c0_22] : memref<128x9xf32, #tpu.memory_space<vmem>>, vector<128x9xf32>
      tpu.vector_store %arg10[%c0_21, %c0_22], %30 {strides = array<i32>} : memref<128x9xf32, #tpu.memory_space<vmem>>, vector<128x9xf32>,
      %cst_23 = arith.constant 0.000000e+00 : f32
      %32 = vector.broadcast %cst_23 : f32 to vector<128x9xf32>
      %c0_24 = arith.constant 0 : index
      %c0_25 = arith.constant 0 : index
      %33 = vector.load %arg11[%c0_24, %c0_25] : memref<128x9xf32, #tpu.memory_space<vmem>>, vector<128x9xf32>
      tpu.vector_store %arg11[%c0_24, %c0_25], %32 {strides = array<i32>} : memref<128x9xf32, #tpu.memory_space<vmem>>, vector<128x9xf32>,
    } else {
    }
    %c0 = arith.constant 0 : index
    %c0_1 = arith.constant 0 : index
    %3 = vector.load %arg2[%c0, %c0_1] : memref<128x1xf32, #tpu.memory_space<vmem>>, vector<128x1xf32>
    %c0_2 = arith.constant 0 : index
    %c0_3 = arith.constant 0 : index
    %4 = vector.load %arg3[%c0_2, %c0_3] : memref<1x128xf32, #tpu.memory_space<vmem>>, vector<1x128xf32>
    %5 = vector.broadcast %3 : vector<128x1xf32> to vector<128x128xf32>
    %6 = vector.broadcast %4 : vector<1x128xf32> to vector<128x128xf32>
    %7 = arith.subf %5, %6 : vector<128x128xf32>
    %8 = arith.mulf %7, %7 : vector<128x128xf32>
    %c0_4 = arith.constant 0 : index
    %c0_5 = arith.constant 0 : index
    %9 = memref.load %arg8[%c0_4, %c0_5] : memref<1x2xf32, #tpu.memory_space<smem>>
    %cst = arith.constant 0.000000e+00 : f32
    %10 = arith.subf %cst, %9 : f32
    %11 = vector.broadcast %10 : f32 to vector<128x128xf32>
    %12 = arith.mulf %11, %8 : vector<128x128xf32>
    %13 = math.exp %12 : vector<128x128xf32>
    %14 = arith.mulf %13, %13 : vector<128x128xf32>
    %15 = arith.mulf %14, %14 : vector<128x128xf32>
    %16 = arith.mulf %15, %15 : vector<128x128xf32>
    %17 = arith.mulf %14, %16 : vector<128x128xf32>
    %c0_6 = arith.constant 0 : index
    %c0_7 = arith.constant 0 : index
    %18 = vector.load %arg4[%c0_6, %c0_7] : memref<128x9xf32, #tpu.memory_space<vmem>>, vector<128x9xf32>
    %c0_8 = arith.constant 0 : index
    %c0_9 = arith.constant 0 : index
    %19 = vector.load %arg10[%c0_8, %c0_9] : memref<128x9xf32, #tpu.memory_space<vmem>>, vector<128x9xf32>
    %cst_10 = arith.constant dense<0.000000e+00> : vector<128x9xf32>
    %20 = tpu.matmul %13, %18, %cst_10 {dimension_numbers = #tpu.dot_dimension_numbers<[1], [0], [0], [1], [0, 0, 1, 1], [], []>} : vector<128x128xf32>, vector<128x9xf32>, vector<128x9xf32> -> vector<128x9xf32>
    %21 = arith.addf %19, %20 : vector<128x9xf32>
    %c0_11 = arith.constant 0 : index
    %c0_12 = arith.constant 0 : index
    %22 = vector.load %arg10[%c0_11, %c0_12] : memref<128x9xf32, #tpu.memory_space<vmem>>, vector<128x9xf32>
    tpu.vector_store %arg10[%c0_11, %c0_12], %21 {strides = array<i32>} : memref<128x9xf32, #tpu.memory_space<vmem>>, vector<128x9xf32>,
    %c0_13 = arith.constant 0 : index
    %c0_14 = arith.constant 0 : index
    %23 = vector.load %arg11[%c0_13, %c0_14] : memref<128x9xf32, #tpu.memory_space<vmem>>, vector<128x9xf32>
    %cst_15 = arith.constant dense<0.000000e+00> : vector<128x9xf32>
    %24 = tpu.matmul %17, %18, %cst_15 {dimension_numbers = #tpu.dot_dimension_numbers<[1], [0], [0], [1], [0, 0, 1, 1], [], []>} : vector<128x128xf32>, vector<128x9xf32>, vector<128x9xf32> -> vector<128x9xf32>
    %25 = arith.addf %23, %24 : vector<128x9xf32>
    %c0_16 = arith.constant 0 : index
    %c0_17 = arith.constant 0 : index
    %26 = vector.load %arg11[%c0_16, %c0_17] : memref<128x9xf32, #tpu.memory_space<vmem>>, vector<128x9xf32>
    tpu.vector_store %arg11[%c0_16, %c0_17], %25 {strides = array<i32>} : memref<128x9xf32, #tpu.memory_space<vmem>>, vector<128x9xf32>,
    %c0_i32_18 = arith.constant 0 : i32
    %27 = arith.cmpi eq, %arg1, %c0_i32_18 : i32
    %28 = arith.extui %27 : i1 to i32
    %c0_i32_19 = arith.constant 0 : i32
    %29 = arith.cmpi ne, %28, %c0_i32_19 : i32
    scf.if %29 {
      %c0_20 = arith.constant 0 : index
      %c0_21 = arith.constant 0 : index
      %30 = vector.load %arg5[%c0_20, %c0_21] : memref<1x4xf32, #tpu.memory_space<vmem>>, vector<1x4xf32>
      %c0_22 = arith.constant 0 : index
      %c0_23 = arith.constant 0 : index
      %31 = vector.load %arg6[%c0_22, %c0_23] : memref<1x4xf32, #tpu.memory_space<vmem>>, vector<1x4xf32>
      %c0_24 = arith.constant 0 : index
      %c0_25 = arith.constant 0 : index
      %32 = vector.load %arg10[%c0_24, %c0_25] : memref<128x9xf32, #tpu.memory_space<vmem>>, vector<128x9xf32>
      %c0_26 = arith.constant 0 : index
      %c0_27 = arith.constant 0 : index
      %33 = vector.load %arg11[%c0_26, %c0_27] : memref<128x9xf32, #tpu.memory_space<vmem>>, vector<128x9xf32>
      %34 = vector.extract_strided_slice %32 {offsets = [0, 0], sizes = [128, 4], strides = [1, 1]} : vector<128x9xf32> to vector<128x4xf32>
      %35 = vector.broadcast %30 : vector<1x4xf32> to vector<128x4xf32>
      %36 = arith.addf %34, %35 : vector<128x4xf32>
      %37 = vector.extract_strided_slice %32 {offsets = [0, 4], sizes = [128, 4], strides = [1, 1]} : vector<128x9xf32> to vector<128x4xf32>
      %38 = vector.broadcast %31 : vector<1x4xf32> to vector<128x4xf32>
      %39 = arith.addf %37, %38 : vector<128x4xf32>
      %40 = vector.extract_strided_slice %33 {offsets = [0, 0], sizes = [128, 4], strides = [1, 1]} : vector<128x9xf32> to vector<128x4xf32>
      %41 = vector.broadcast %30 : vector<1x4xf32> to vector<128x4xf32>
      %42 = arith.addf %40, %41 : vector<128x4xf32>
      %43 = vector.extract_strided_slice %33 {offsets = [0, 4], sizes = [128, 4], strides = [1, 1]} : vector<128x9xf32> to vector<128x4xf32>
      %44 = vector.broadcast %31 : vector<1x4xf32> to vector<128x4xf32>
      %45 = arith.addf %43, %44 : vector<128x4xf32>
      %46 = vector.extract_strided_slice %32 {offsets = [0, 8], sizes = [128, 1], strides = [1, 1]} : vector<128x9xf32> to vector<128x1xf32>
      %c0_28 = arith.constant 0 : index
      %c1 = arith.constant 1 : index
      %47 = memref.load %arg8[%c0_28, %c1] : memref<1x2xf32, #tpu.memory_space<smem>>
      %48 = vector.broadcast %47 : f32 to vector<128x1xf32>
      %49 = arith.addf %46, %48 : vector<128x1xf32>
      %c0_29 = arith.constant 0 : index
      %c0_30 = arith.constant 0 : index
      %50 = vector.load %arg7[%c0_29, %c0_30] : memref<4x4xf32, #tpu.memory_space<vmem>>, vector<4x4xf32>
      %cst_31 = arith.constant dense<0.000000e+00> : vector<128x4xf32>
      %51 = tpu.matmul %39, %50, %cst_31 {dimension_numbers = #tpu.dot_dimension_numbers<[1], [0], [0], [1], [0, 0, 1, 1], [], []>} : vector<128x4xf32>, vector<4x4xf32>, vector<128x4xf32> -> vector<128x4xf32>
      %52 = tpu.reciprocal %49 {approx = true} : vector<128x1xf32> -> vector<128x1xf32>
      %53 = vector.broadcast %52 : vector<128x1xf32> to vector<128x4xf32>
      %54 = arith.mulf %51, %53 : vector<128x4xf32>
      %55 = tpu.reciprocal %42 {approx = true} : vector<128x4xf32> -> vector<128x4xf32>
      %56 = arith.mulf %45, %55 : vector<128x4xf32>
      %cst_32 = arith.constant 1.250000e-01 : f32
      %57 = vector.broadcast %cst_32 : f32 to vector<128x4xf32>
      %58 = arith.mulf %36, %57 : vector<128x4xf32>
      %59 = arith.subf %56, %54 : vector<128x4xf32>
      %60 = vector.shape_cast %58 : vector<128x4xf32> to vector<1x128x4xf32>
      %61 = vector.shape_cast %54 : vector<128x4xf32> to vector<1x128x4xf32>
      %62 = vector.shape_cast %59 : vector<128x4xf32> to vector<1x128x4xf32>
      %63 = tpu.concatenate %60, %61, %62 in 0 : vector<1x128x4xf32>, vector<1x128x4xf32>, vector<1x128x4xf32> -> vector<3x128x4xf32>
      %c0_33 = arith.constant 0 : index
      %c0_34 = arith.constant 0 : index
      %c0_35 = arith.constant 0 : index
      %64 = vector.load %arg9[%c0_33, %c0_34, %c0_35] : memref<3x128x4xf32, #tpu.memory_space<vmem>>, vector<3x128x4xf32>
      tpu.vector_store %arg9[%c0_33, %c0_34, %c0_35], %63 {strides = array<i32>} : memref<3x128x4xf32, #tpu.memory_space<vmem>>, vector<3x128x4xf32>,
    } else {
    }
    return
  }
  func.func @transform_0(%arg0: i32, %arg1: i32) -> (i32, i32) {
    %c0_i32 = arith.constant 0 : i32
    %c0_i32_0 = arith.constant 0 : i32
    return %arg0, %c0_i32 : i32, i32
  }
  func.func @transform_1(%arg0: i32, %arg1: i32) -> (i32, i32) {
    %c0_i32 = arith.constant 0 : i32
    %c0_i32_0 = arith.constant 0 : i32
    return %c0_i32, %arg1 : i32, i32
  }
  func.func @transform_2(%arg0: i32, %arg1: i32) -> (i32, i32) {
    %c0_i32 = arith.constant 0 : i32
    %c0_i32_0 = arith.constant 0 : i32
    return %arg1, %c0_i32 : i32, i32
  }
  func.func @transform_3(%arg0: i32, %arg1: i32) -> (i32, i32) {
    %c0_i32 = arith.constant 0 : i32
    %c0_i32_0 = arith.constant 0 : i32
    %c0_i32_1 = arith.constant 0 : i32
    return %c0_i32, %c0_i32_0 : i32, i32
  }
  func.func @transform_4(%arg0: i32, %arg1: i32) -> (i32, i32) {
    %c0_i32 = arith.constant 0 : i32
    %c0_i32_0 = arith.constant 0 : i32
    %c0_i32_1 = arith.constant 0 : i32
    return %c0_i32, %c0_i32_0 : i32, i32
  }
  func.func @transform_5(%arg0: i32, %arg1: i32) -> (i32, i32) {
    %c0_i32 = arith.constant 0 : i32
    %c0_i32_0 = arith.constant 0 : i32
    %c0_i32_1 = arith.constant 0 : i32
    return %c0_i32, %c0_i32_0 : i32, i32
  }
  func.func @transform_6(%arg0: i32, %arg1: i32) -> (i32, i32) {
    %c0_i32 = arith.constant 0 : i32
    %c0_i32_0 = arith.constant 0 : i32
    %c0_i32_1 = arith.constant 0 : i32
    return %c0_i32, %c0_i32_0 : i32, i32
  }
  func.func @transform_7(%arg0: i32, %arg1: i32) -> (i32, i32, i32) {
    %c0_i32 = arith.constant 0 : i32
    %c0_i32_0 = arith.constant 0 : i32
    %c0_i32_1 = arith.constant 0 : i32
    return %c0_i32, %arg0, %c0_i32_0 : i32, i32, i32
  }
}

</mosaic_0001>

<bundles_post_ra>
// kernel: tpu_custom_call.1
= control target key start
LH: loop header
LB: loop body
LE: loop exit
PB: predicated region body
PF: predicated region fallthrough
CT: control target
= control target key end

     0   :  { %12 = vsyncpa [#allocation5], 0  ;;  %s2638_s0 = inlined_call_operand.vmem [shape: f32[128,1], index: 0, kind: input, shape index: {}]   ;;  %s2639_s1 = inlined_call_operand.vmem [shape: f32[1,128], index: 1, kind: input, shape index: {}]   ;;  %s2640_s2 = inlined_call_operand.vmem [shape: f32[128,9], index: 2, kind: input, shape index: {}]   ;;  %s2641_s3 = inlined_call_operand.vmem [shape: f32[1,4], index: 3, kind: input, shape index: {}]   ;;  %s2642_s4 = inlined_call_operand.vmem [shape: f32[1,4], index: 4, kind: input, shape index: {}]   ;;  %s2643_s5 = inlined_call_operand.vmem [shape: f32[4,4], index: 5, kind: input, shape index: {}]   ;;  %s2644_s6 = inlined_call_operand.vmem [shape: f32[1,2], index: 6, kind: input, shape index: {}]   ;;  %s2645_s7 = inlined_call_operand.vmem [shape: f32[3,128,4], index: 7, kind: output, shape index: {}]  }
   0x1   :  { %s31_s26 = sshll.u32 %s2644_s6, 4  ;;  %s32_s26 = int_to_ptr.vmem [resolvable:$true] %s31_s26 }
   0x2   :  { %s1862_s27 = scalar_lea.vmem %s32_s26, 16  ;;  %p1867_p1 = scmp.lt.s32.totalorder %s32_s26, %s32_s26 }
   0x3   :  { %p1863_p0 = scmp.ne.s32.totalorder %s32_s26, %s1862_s27  ;;  %p1868_p2 = scmp.lt.s32.totalorder %s1862_s27, %s1862_s27 }
   0x5   :  { %p1869_p3 = por %p1868_p2, %p1867_p1 }
   0x7   :  { %p1870_p4 = pnand %p1869_p3, %p1863_p0 }
   0x9   :  { %1873 = shalt.err (!%p1870_p4)
}
   0xa   :  { %s1876_s28 = smov [#allocation4]  }
   0xb   :  { %34 = dma.vmem_to_smem %s32_s26, 16, %s1876_s28, [#allocation5]  }
   0xc   :  { %1874 = dma.done.wait [#allocation5], 16  }
   0xd   :  { %1875 = vsyncadd [#allocation5], 4294967280 }
   0xe   :  { %38 = sfence }
   0xf   :  { %v78_v0 = vld [vmem:[%s2638_s0 + $0x10] sm:$0xff]  ;;  %v76_v1 = vld [vmem:[%s2638_s0] sm:$0xff]  ;;  %v1877_v2 = vmov 0   ;;  %v79_v3 = vld [vmem:[%s2638_s0 + $0x18] sm:$0xff]  ;;  %vm43_vm0 = vcmask 72704   ;;  %s1878_s22 = smov 4  }
  0x10   :  { %1763 = vset.pattern.permute.xlu1 %v1877_v2  ;;  %1762 = vset.pattern.permute.xlu0 %v1877_v2  ;;  %v77_v4 = vld [vmem:[%s2638_s0 + $0x8] sm:$0xff]  ;;  %v341_v5 = vld [vmem:[%s2640_s2 + $0x78] sm:$0xff]  ;;  %v340_v6 = vld [vmem:[%s2640_s2 + $0x70] sm:$0xff]  ;;  %v1879_v34 = vmov 0.0   ;;  %vm944_vm1 = vcmask 1043456   ;;  %vm911_vm2 = vcmask 31744  }
  0x11   :  { %105 = vperm.xlu1 %1763, %v78_v0   ;;  %95 = vperm.xlu0 %1762, %v76_v1   ;;  %v81_v7 = vld [vmem:[%s2638_s0 + $0x28] sm:$0xff]  ;;  %v80_v8 = vld [vmem:[%s2638_s0 + $0x20] sm:$0xff]  ;;  %v83_v10 = vld [vmem:[%s2638_s0 + $0x38] sm:$0xff]  ;;  %45 = vst.msk [vmem:[#allocation2 + $0x8] sm:$0xff] %vm43_vm0, %v1879_v34  ;;  %s2133_s27 = sld [smem:[#allocation4 + $0x1]] }
  0x12   :  { %1616 = vmatprep.subr.mxu0 %v341_v5  ;;  %1672 = vmatprep.subr.mxu1 %v341_v5  ;;  %v339_v9 = vld [vmem:[%s2640_s2 + $0x68] sm:$0xff]  ;;  %v82_v11 = vld [vmem:[%s2638_s0 + $0x30] sm:$0xff]  ;;  %v338_v12 = vld [vmem:[%s2640_s2 + $0x60] sm:$0xff]  ;;  %44 = vst.msk [vmem:[#allocation2] sm:$0xff] %vm43_vm0, %v1879_v34 }
  0x13   :  { %1617 = vmatpush3.msra.mxu0 %v341_v5  ;;  %1673 = vmatpush3.msra.mxu1 %v341_v5  ;;  %v337_v13 = vld [vmem:[%s2640_s2 + $0x58] sm:$0xff]  ;;  %v85_v14 = vld [vmem:[%s2638_s0 + $0x48] sm:$0xff]  ;;  %v84_v15 = vld [vmem:[%s2638_s0 + $0x40] sm:$0xff]  ;;  %46 = vst.msk [vmem:[#allocation2 + $0x10] sm:$0xff] %vm43_vm0, %v1879_v34 }
  0x14   :  { %1618 = vmatprep.subr.mxu0 %v340_v6  ;;  %1674 = vmatprep.subr.mxu1 %v340_v6  ;;  %v336_v16 = vld [vmem:[%s2640_s2 + $0x50] sm:$0xff]  ;;  %v87_v17 = vld [vmem:[%s2638_s0 + $0x58] sm:$0xff]  ;;  %v335_v19 = vld [vmem:[%s2640_s2 + $0x48] sm:$0xff]  ;;  %47 = vst.msk [vmem:[#allocation2 + $0x18] sm:$0xff] %vm43_vm0, %v1879_v34 }
  0x15   :  { %110 = vperm.xlu1 %1763, %v79_v3   ;;  %100 = vperm.xlu0 %1762, %v77_v4   ;;  %v86_v18 = vld [vmem:[%s2638_s0 + $0x50] sm:$0xff]  ;;  %v334_v20 = vld [vmem:[%s2640_s2 + $0x40] sm:$0xff]  ;;  %v89_v21 = vld [vmem:[%s2638_s0 + $0x68] sm:$0xff]  ;;  %48 = vst.msk [vmem:[#allocation2 + $0x20] sm:$0xff] %vm43_vm0, %v1879_v34 }
  0x16   :  { %1619 = vmatpush3.msra.mxu0 %v340_v6  ;;  %1675 = vmatpush3.msra.mxu1 %v340_v6  ;;  %v88_v22 = vld [vmem:[%s2638_s0 + $0x60] sm:$0xff]  ;;  %v333_v23 = vld [vmem:[%s2640_s2 + $0x38] sm:$0xff]  ;;  %v90_v25 = vld [vmem:[%s2638_s0 + $0x70] sm:$0xff]  ;;  %49 = vst.msk [vmem:[#allocation2 + $0x28] sm:$0xff] %vm43_vm0, %v1879_v34 }
  0x17   :  { %1620 = vmatprep.subr.mxu0 %v339_v9  ;;  %1676 = vmatprep.subr.mxu1 %v339_v9  ;;  %v91_v24 = vld [vmem:[%s2638_s0 + $0x78] sm:$0xff]  ;;  %v332_v26 = vld [vmem:[%s2640_s2 + $0x30] sm:$0xff]  ;;  %v331_v27 = vld [vmem:[%s2640_s2 + $0x28] sm:$0xff]  ;;  %50 = vst.msk [vmem:[#allocation2 + $0x30] sm:$0xff] %vm43_vm0, %v1879_v34 }
  0x18   :  { %1621 = vmatpush3.msra.mxu0 %v339_v9  ;;  %1677 = vmatpush3.msra.mxu1 %v339_v9  ;;  %v330_v28 = vld [vmem:[%s2640_s2 + $0x20] sm:$0xff]  ;;  %v329_v29 = vld [vmem:[%s2640_s2 + $0x18] sm:$0xff]  ;;  %v328_v30 = vld [vmem:[%s2640_s2 + $0x10] sm:$0xff]  ;;  %51 = vst.msk [vmem:[#allocation2 + $0x38] sm:$0xff] %vm43_vm0, %v1879_v34 }
  0x19   :  { %120 = vperm.xlu1 %1763, %v81_v7   ;;  %115 = vperm.xlu0 %1762, %v80_v8   ;;  %v327_v31 = vld [vmem:[%s2640_s2 + $0x8] sm:$0xff]  ;;  %v326_v32 = vld [vmem:[%s2640_s2] sm:$0xff]  ;;  %52 = vst.msk [vmem:[#allocation2 + $0x40] sm:$0xff] %vm43_vm0, %v1879_v34  ;;  %53 = vst.msk [vmem:[#allocation2 + $0x48] sm:$0xff] %vm43_vm0, %v1879_v34  ;;  %s211_s2 = sld [smem:[#allocation4]] }
  0x1a   :  { %1622 = vmatprep.subr.mxu0 %v338_v12  ;;  %1678 = vmatprep.subr.mxu1 %v338_v12  ;;  %v1516_v33 = vld [vmem:[%s2642_s4] ss:$0 sm:$0xff]  ;;  %54 = vst.msk [vmem:[#allocation2 + $0x50] sm:$0xff] %vm43_vm0, %v1879_v34  ;;  %55 = vst.msk [vmem:[#allocation2 + $0x58] sm:$0xff] %vm43_vm0, %v1879_v34 }
  0x1b   :  { %1623 = vmatpush3.msra.mxu0 %v338_v12  ;;  %1679 = vmatpush3.msra.mxu1 %v338_v12  ;;  %56 = vst.msk [vmem:[#allocation2 + $0x60] sm:$0xff] %vm43_vm0, %v1879_v34  ;;  %57 = vst.msk [vmem:[#allocation2 + $0x68] sm:$0xff] %vm43_vm0, %v1879_v34  ;;  %v2060_v35 = vld [vmem:[%s2639_s1] ss:$0 sm:$0xff] }
  0x1c   :  { %1624 = vmatprep.subr.mxu0 %v337_v13  ;;  %1680 = vmatprep.subr.mxu1 %v337_v13  ;;  %58 = vst.msk [vmem:[#allocation2 + $0x70] sm:$0xff] %vm43_vm0, %v1879_v34  ;;  %59 = vst.msk [vmem:[#allocation2 + $0x78] sm:$0xff] %vm43_vm0, %v1879_v34 }
  0x1d   :  { %130 = vperm.xlu1 %1763, %v83_v10   ;;  %125 = vperm.xlu0 %1762, %v82_v11   ;;  %60 = vst.msk [vmem:[#allocation3] sm:$0xff] %vm43_vm0, %v1879_v34  ;;  %61 = vst.msk [vmem:[#allocation3 + $0x8] sm:$0xff] %vm43_vm0, %v1879_v34 }
  0x1e   :  { %1625 = vmatpush3.msra.mxu0 %v337_v13  ;;  %1681 = vmatpush3.msra.mxu1 %v337_v13  ;;  %62 = vst.msk [vmem:[#allocation3 + $0x10] sm:$0xff] %vm43_vm0, %v1879_v34  ;;  %63 = vst.msk [vmem:[#allocation3 + $0x18] sm:$0xff] %vm43_vm0, %v1879_v34 }
  0x1f   :  { %1626 = vmatprep.subr.mxu0 %v336_v16  ;;  %1682 = vmatprep.subr.mxu1 %v336_v16  ;;  %64 = vst.msk [vmem:[#allocation3 + $0x20] sm:$0xff] %vm43_vm0, %v1879_v34  ;;  %65 = vst.msk [vmem:[#allocation3 + $0x28] sm:$0xff] %vm43_vm0, %v1879_v34  ;;  %s212_s24 = ssub.f32 0.0, %s211_s2 }
  0x20   :  { %1627 = vmatpush3.msra.mxu0 %v336_v16  ;;  %1683 = vmatpush3.msra.mxu1 %v336_v16  ;;  %66 = vst.msk [vmem:[#allocation3 + $0x30] sm:$0xff] %vm43_vm0, %v1879_v34  ;;  %67 = vst.msk [vmem:[#allocation3 + $0x38] sm:$0xff] %vm43_vm0, %v1879_v34 }
  0x21   :  { %140 = vperm.xlu1 %1763, %v85_v14   ;;  %135 = vperm.xlu0 %1762, %v84_v15   ;;  %68 = vst.msk [vmem:[#allocation3 + $0x40] sm:$0xff] %vm43_vm0, %v1879_v34  ;;  %69 = vst.msk [vmem:[#allocation3 + $0x48] sm:$0xff] %vm43_vm0, %v1879_v34  ;;  %v2064_v40 = vstv %s212_s24 }
  0x22   :  { %1628 = vmatprep.subr.mxu0 %v335_v19  ;;  %1684 = vmatprep.subr.mxu1 %v335_v19  ;;  %70 = vst.msk [vmem:[#allocation3 + $0x50] sm:$0xff] %vm43_vm0, %v1879_v34  ;;  %71 = vst.msk [vmem:[#allocation3 + $0x58] sm:$0xff] %vm43_vm0, %v1879_v34 }
  0x23   :  { %1629 = vmatpush3.msra.mxu0 %v335_v19  ;;  %1685 = vmatpush3.msra.mxu1 %v335_v19  ;;  %72 = vst.msk [vmem:[#allocation3 + $0x60] sm:$0xff] %vm43_vm0, %v1879_v34  ;;  %73 = vst.msk [vmem:[#allocation3 + $0x68] sm:$0xff] %vm43_vm0, %v1879_v34 }
  0x24   :  { %1630 = vmatprep.subr.mxu0 %v334_v20  ;;  %1686 = vmatprep.subr.mxu1 %v334_v20  ;;  %74 = vst.msk [vmem:[#allocation3 + $0x70] sm:$0xff] %vm43_vm0, %v1879_v34  ;;  %75 = vst.msk [vmem:[#allocation3 + $0x78] sm:$0xff] %vm43_vm0, %v1879_v34 }
  0x25   :  { %150 = vperm.xlu1 %1763, %v87_v17   ;;  %145 = vperm.xlu0 %1762, %v86_v18  }
  0x26   :  { %1631 = vmatpush3.msra.mxu0 %v334_v20  ;;  %1687 = vmatpush3.msra.mxu1 %v334_v20 }
  0x27   :  { %1632 = vmatprep.subr.mxu0 %v333_v23  ;;  %1688 = vmatprep.subr.mxu1 %v333_v23 }
  0x28   :  { %1633 = vmatpush3.msra.mxu0 %v333_v23  ;;  %1689 = vmatpush3.msra.mxu1 %v333_v23 }
  0x29   :  { %160 = vperm.xlu1 %1763, %v89_v21   ;;  %155 = vperm.xlu0 %1762, %v88_v22  }
  0x2a   :  { %1634 = vmatprep.subr.mxu0 %v332_v26  ;;  %1690 = vmatprep.subr.mxu1 %v332_v26 }
  0x2b   :  { %1635 = vmatpush3.msra.mxu0 %v332_v26  ;;  %1691 = vmatpush3.msra.mxu1 %v332_v26 }
  0x2c   :  { %1636 = vmatprep.subr.mxu0 %v331_v27  ;;  %1692 = vmatprep.subr.mxu1 %v331_v27 }
  0x2d   :  { %170 = vperm.xlu1 %1763, %v91_v24   ;;  %165 = vperm.xlu0 %1762, %v90_v25  }
  0x2e   :  { %1637 = vmatpush3.msra.mxu0 %v331_v27  ;;  %1693 = vmatpush3.msra.mxu1 %v331_v27 }
  0x2f   :  { %1638 = vmatprep.subr.mxu0 %v330_v28  ;;  %1694 = vmatprep.subr.mxu1 %v330_v28 }
  0x30   :  { %1639 = vmatpush3.msra.mxu0 %v330_v28  ;;  %1695 = vmatpush3.msra.mxu1 %v330_v28 }
  0x31   :  { %1640 = vmatprep.subr.mxu0 %v329_v29  ;;  %1696 = vmatprep.subr.mxu1 %v329_v29 }
  0x32   :  { %1641 = vmatpush3.msra.mxu0 %v329_v29  ;;  %1697 = vmatpush3.msra.mxu1 %v329_v29 }
  0x33   :  { %1642 = vmatprep.subr.mxu0 %v328_v30  ;;  %1698 = vmatprep.subr.mxu1 %v328_v30 }
  0x34   :  { %1643 = vmatpush3.msra.mxu0 %v328_v30  ;;  %1699 = vmatpush3.msra.mxu1 %v328_v30 }
  0x35   :  { %1644 = vmatprep.subr.mxu0 %v327_v31  ;;  %1700 = vmatprep.subr.mxu1 %v327_v31 }
  0x36   :  { %1645 = vmatpush3.msra.mxu0 %v327_v31  ;;  %1701 = vmatpush3.msra.mxu1 %v327_v31 }
  0x37   :  { %1646 = vmatprep.subr.mxu0 %v326_v32  ;;  %1702 = vmatprep.subr.mxu1 %v326_v32 }
  0x38   :  { %1647 = vmatpush3.msra.mxu0 %v326_v32  ;;  %1703 = vmatpush3.msra.mxu1 %v326_v32 }
  0x39   :  { %793 = vrot.lane.b32.xlu0 %v1516_v33, %s1878_s22 }
  0x8c   :  { %v106_v36 = vpop.permute.xlu1 %105  ;;  %v96_v37 = vpop.permute.xlu0 %95 }
  0x8d   :  { %v181_v38 = vsub.f32 %v106_v36, %v2060_v35  ;;  %v179_v39 = vsub.f32 %v96_v37, %v2060_v35 }
  0x8f   :  { %v197_v41 = vmul.f32 %v181_v38, %v181_v38  ;;  %v195_v42 = vmul.f32 %v179_v39, %v179_v39 }
  0x90   :  { %v111_v43 = vpop.permute.xlu1 %110  ;;  %v101_v44 = vpop.permute.xlu0 %100 }
  0x91   :  { %v216_v45 = vmul.f32 %v2064_v40, %v197_v41  ;;  %v214_v46 = vmul.f32 %v2064_v40, %v195_v42  ;;  %v182_v47 = vsub.f32 %v111_v43, %v2060_v35  ;;  %v180_v48 = vsub.f32 %v101_v44, %v2060_v35 }
  0x93   :  { %v234_v49 = vmul.f32 1.442695, %v216_v45  ;;  %v230_v50 = vmul.f32 1.442695, %v214_v46  ;;  %v198_v51 = vmul.f32 %v182_v47, %v182_v47  ;;  %v196_v52 = vmul.f32 %v180_v48, %v180_v48 }
  0x94   :  { %v121_v53 = vpop.permute.xlu1 %120  ;;  %v116_v54 = vpop.permute.xlu0 %115 }
  0x95   :  { %1766 = vpow2.f32 %v234_v49  ;;  %v217_v55 = vmul.f32 %v2064_v40, %v198_v51  ;;  %v215_v56 = vmul.f32 %v2064_v40, %v196_v52  ;;  %v184_v57 = vsub.f32 %v121_v53, %v2060_v35 }
  0x96   :  { %1768 = vpow2.f32 %v230_v50  ;;  %v183_v58 = vsub.f32 %v116_v54, %v2060_v35 }
  0x97   :  { %v236_v59 = vmul.f32 1.442695, %v217_v55  ;;  %v232_v60 = vmul.f32 1.442695, %v215_v56  ;;  %v200_v61 = vmul.f32 %v184_v57, %v184_v57 }
  0x98   :  { %v199_v62 = vmul.f32 %v183_v58, %v183_v58  ;;  %v131_v63 = vpop.permute.xlu1 %130  ;;  %v126_v0 = vpop.permute.xlu0 %125 }
  0x99   :  { %1770 = vpow2.f32 %v236_v59  ;;  %v219_v1 = vmul.f32 %v2064_v40, %v200_v61  ;;  %v186_v2 = vsub.f32 %v131_v63, %v2060_v35  ;;  %v185_v3 = vsub.f32 %v126_v0, %v2060_v35 }
  0x9a   :  { %1772 = vpow2.f32 %v232_v60  ;;  %v218_v4 = vmul.f32 %v2064_v40, %v199_v62 }
  0x9b   :  { %v240_v5 = vmul.f32 1.442695, %v219_v1  ;;  %v202_v6 = vmul.f32 %v186_v2, %v186_v2  ;;  %v201_v7 = vmul.f32 %v185_v3, %v185_v3 }
  0x9c   :  { %v238_v8 = vmul.f32 1.442695, %v218_v4  ;;  %v141_v9 = vpop.permute.xlu1 %140  ;;  %v136_v10 = vpop.permute.xlu0 %135 }
  0x9d   :  { %1774 = vpow2.f32 %v240_v5  ;;  %v221_v11 = vmul.f32 %v2064_v40, %v202_v6  ;;  %v220_v12 = vmul.f32 %v2064_v40, %v201_v7  ;;  %v188_v13 = vsub.f32 %v141_v9, %v2060_v35 }
  0x9e   :  { %1776 = vpow2.f32 %v238_v8  ;;  %v187_v14 = vsub.f32 %v136_v10, %v2060_v35 }
  0x9f   :  { %v244_v15 = vmul.f32 1.442695, %v221_v11  ;;  %v242_v16 = vmul.f32 1.442695, %v220_v12  ;;  %v204_v17 = vmul.f32 %v188_v13, %v188_v13 }
  0xa0   :  { %v203_v18 = vmul.f32 %v187_v14, %v187_v14  ;;  %v151_v19 = vpop.permute.xlu1 %150  ;;  %v146_v20 = vpop.permute.xlu0 %145 }
  0xa1   :  { %1778 = vpow2.f32 %v244_v15  ;;  %v223_v21 = vmul.f32 %v2064_v40, %v204_v17  ;;  %v190_v22 = vsub.f32 %v151_v19, %v2060_v35  ;;  %v189_v23 = vsub.f32 %v146_v20, %v2060_v35 }
  0xa2   :  { %v1767_v24 = vpop.eup %1766  ;;  %1780 = vpow2.f32 %v242_v16  ;;  %v222_v25 = vmul.f32 %v2064_v40, %v203_v18 }
  0xa3   :  { %v1769_v26 = vpop.eup %1768  ;;  %v248_v27 = vmul.f32 1.442695, %v223_v21  ;;  %v206_v28 = vmul.f32 %v190_v22, %v190_v22  ;;  %v205_v29 = vmul.f32 %v189_v23, %v189_v23  ;;  %v264_v30 = vmul.f32 %v1767_v24, %v1767_v24 }
  0xa4   :  { %v246_v31 = vmul.f32 1.442695, %v222_v25  ;;  %1648 = vmatprep.mubr.f32.mxu0 %v1769_v26  ;;  %v161_v32 = vpop.permute.xlu1 %160  ;;  %v156_v33 = vpop.permute.xlu0 %155  ;;  %v262_v34 = vmul.f32 %v1769_v26, %v1769_v26 }
  0xa5   :  { %1782 = vpow2.f32 %v248_v27  ;;  %v225_v36 = vmul.f32 %v2064_v40, %v206_v28  ;;  %v224_v37 = vmul.f32 %v2064_v40, %v205_v29  ;;  %v192_v38 = vsub.f32 %v161_v32, %v2060_v35 }
  0xa6   :  { %v1771_v39 = vpop.eup %1770  ;;  %1784 = vpow2.f32 %v246_v31  ;;  %v191_v41 = vsub.f32 %v156_v33, %v2060_v35  ;;  %v278_v42 = vmul.f32 %v262_v34, %v262_v34  ;;  %v280_v43 = vmul.f32 %v264_v30, %v264_v30 }
  0xa7   :  { %v1773_v44 = vpop.eup %1772  ;;  %v252_v45 = vmul.f32 1.442695, %v225_v36  ;;  %v250_v46 = vmul.f32 1.442695, %v224_v37  ;;  %v208_v47 = vmul.f32 %v192_v38, %v192_v38  ;;  %v265_v48 = vmul.f32 %v1771_v39, %v1771_v39 }
  0xa8   :  { %v207_v49 = vmul.f32 %v191_v41, %v191_v41  ;;  %1649 = vmatmul.mubr.f32.vlgmr.msra.gmra.mxu0 %v1773_v44  ;;  %v171_v50 = vpop.permute.xlu1 %170  ;;  %v166_v51 = vpop.permute.xlu0 %165  ;;  %v294_v52 = vmul.f32 %v278_v42, %v278_v42  ;;  %v263_v53 = vmul.f32 %v1773_v44, %v1773_v44  ;;  %v296_v54 = vmul.f32 %v280_v43, %v280_v43 }
  0xa9   :  { %1786 = vpow2.f32 %v252_v45  ;;  %v227_v55 = vmul.f32 %v2064_v40, %v208_v47  ;;  %v194_v56 = vsub.f32 %v171_v50, %v2060_v35  ;;  %1651 = vmatprep.mubr.f32.mxu0 %v1767_v24  ;;  %v193_v57 = vsub.f32 %v166_v51, %v2060_v35 }
  0xaa   :  { %v1775_v58 = vpop.eup %1774  ;;  %1788 = vpow2.f32 %v250_v46  ;;  %v226_v59 = vmul.f32 %v2064_v40, %v207_v49  ;;  %v310_v60 = vmul.f32 %v294_v52, %v262_v34  ;;  %v279_v61 = vmul.f32 %v263_v53, %v263_v53 }
  0xab   :  { %v1777_v62 = vpop.eup %1776  ;;  %v256_v63 = vmul.f32 1.442695, %v227_v55  ;;  %v210_v0 = vmul.f32 %v194_v56, %v194_v56  ;;  %v209_v1 = vmul.f32 %v193_v57, %v193_v57  ;;  %v312_v2 = vmul.f32 %v296_v54, %v264_v30 }
  0xac   :  { %v254_v3 = vmul.f32 1.442695, %v226_v59  ;;  %1652 = vmatmul.mubr.f32.gmra.mxu0 %v1771_v39  ;;  %1704 = vmatprep.mubr.f32.mxu1 %v310_v60  ;;  %v295_v4 = vmul.f32 %v279_v61, %v279_v61  ;;  %v281_v5 = vmul.f32 %v265_v48, %v265_v48  ;;  %v266_v6 = vmul.f32 %v1777_v62, %v1777_v62 }
  0xad   :  { %1790 = vpow2.f32 %v256_v63  ;;  %v229_v35 = vmul.f32 %v2064_v40, %v210_v0  ;;  %v228_v7 = vmul.f32 %v2064_v40, %v209_v1  ;;  %1654 = vmatprep.mubr.f32.mxu0 %v1777_v62  ;;  %v267_v8 = vmul.f32 %v1775_v58, %v1775_v58 }
  0xae   :  { %v1779_v9 = vpop.eup %1778  ;;  %1792 = vpow2.f32 %v254_v3  ;;  %v311_v10 = vmul.f32 %v295_v4, %v263_v53  ;;  %v297_v11 = vmul.f32 %v281_v5, %v281_v5  ;;  %v282_v12 = vmul.f32 %v266_v6, %v266_v6 }
  0xaf   :  { %v1781_v13 = vpop.eup %1780  ;;  %v260_v14 = vmul.f32 1.442695, %v229_v35  ;;  %v258_v15 = vmul.f32 1.442695, %v228_v7  ;;  %v283_v16 = vmul.f32 %v267_v8, %v267_v8  ;;  %v269_v17 = vmul.f32 %v1779_v9, %v1779_v9  ;;  %v862_v7 = vld [vmem:[%s2643_s5] sm:$0xf] }
  0xb0   :  { %1655 = vmatmul.mubr.f32.gmra.mxu0 %v1775_v58  ;;  %1705 = vmatmul.mubr.f32.vlgmr.msra.gmra.mxu1 %v311_v10  ;;  %v298_v18 = vmul.f32 %v282_v12, %v282_v12  ;;  %v268_v19 = vmul.f32 %v1781_v13, %v1781_v13  ;;  %v313_v40 = vmul.f32 %v297_v11, %v265_v48  ;;  %v1880_v35 = vmov 8   ;;  %v342_v10 = vld [vmem:[#allocation2] sm:$0xff] }
  0xb1   :  { %1794 = vpow2.f32 %v260_v14  ;;  %1657 = vmatprep.mubr.f32.mxu0 %v1781_v13  ;;  %1707 = vmatprep.mubr.f32.mxu1 %v312_v2  ;;  %v299_v20 = vmul.f32 %v283_v16, %v283_v16  ;;  %v285_v24 = vmul.f32 %v269_v17, %v269_v17  ;;  %v345_v13 = vld [vmem:[#allocation2 + $0x18] sm:$0xff]  ;;  %v344_v16 = vld [vmem:[#allocation2 + $0x10] sm:$0xff] }
  0xb2   :  { %v1783_v21 = vpop.eup %1782  ;;  %1796 = vpow2.f32 %v258_v15  ;;  %v314_v22 = vmul.f32 %v298_v18, %v266_v6  ;;  %v284_v23 = vmul.f32 %v268_v19, %v268_v19  ;;  %1764 = vset.pattern.permute.xlu1 %v1880_v35  ;;  %1765 = vset.pattern.permute.xlu0 %v1880_v35  ;;  %v543_v35 = vld [vmem:[#allocation3 + $0x38] sm:$0xff] }
  0xb3   :  { %v1785_v25 = vpop.eup %1784  ;;  %v271_v26 = vmul.f32 %v1783_v21, %v1783_v21  ;;  %v315_v29 = vmul.f32 %v299_v20, %v267_v8  ;;  %v301_v32 = vmul.f32 %v285_v24, %v285_v24  ;;  %1728 = vmatprep.subr.msk.mxu0 %vm944_vm1, %v862_v7  ;;  %1754 = vmatprep.subr.msk.mxu1 %vm944_vm1, %v862_v7  ;;  %v343_v8 = vld [vmem:[#allocation2 + $0x8] sm:$0xff]  ;;  %v346_v24 = vld [vmem:[#allocation2 + $0x20] sm:$0xff] }
  0xb4   :  { %1658 = vmatmul.mubr.f32.gmra.mxu0 %v1779_v9  ;;  %1708 = vmatmul.mubr.f32.gmra.mxu1 %v313_v40  ;;  %v300_v27 = vmul.f32 %v284_v23, %v284_v23  ;;  %v270_v28 = vmul.f32 %v1785_v25, %v1785_v25  ;;  %v537_v40 = vld [vmem:[#allocation3 + $0x8] sm:$0xff] }
  0xb5   :  { %1660 = vmatprep.mubr.f32.mxu0 %v1785_v25  ;;  %1710 = vmatprep.mubr.f32.mxu1 %v314_v22  ;;  %v287_v34 = vmul.f32 %v271_v26, %v271_v26  ;;  %v317_v43 = vmul.f32 %v301_v32, %v269_v17  ;;  %v536_v25 = vld [vmem:[#allocation3] sm:$0xff]  ;;  %v539_v32 = vld [vmem:[#allocation3 + $0x18] sm:$0xff] }
  0xb6   :  { %v1787_v30 = vpop.eup %1786  ;;  %v316_v31 = vmul.f32 %v300_v27, %v268_v19  ;;  %v286_v33 = vmul.f32 %v270_v28, %v270_v28  ;;  %1729 = vmatpush3.msk.msra.mxu0 %vm944_vm1, %v862_v7  ;;  %1755 = vmatpush3.msk.msra.mxu1 %vm944_vm1, %v862_v7  ;;  %v347_v19 = vld [vmem:[#allocation2 + $0x28] sm:$0xff] }
  0xb7   :  { %v1789_v36 = vpop.eup %1788  ;;  %v273_v37 = vmul.f32 %v1787_v30, %v1787_v30  ;;  %v303_v45 = vmul.f32 %v287_v34, %v287_v34 }
  0xb8   :  { %1661 = vmatmul.mubr.f32.gmra.mxu0 %v1783_v21  ;;  %1711 = vmatmul.mubr.f32.gmra.mxu1 %v315_v29  ;;  %v302_v38 = vmul.f32 %v286_v33, %v286_v33  ;;  %v272_v39 = vmul.f32 %v1789_v36, %v1789_v36  ;;  %v2102_v21 = vpop.permute.xlu0 %793 }
  0xb9   :  { %1663 = vmatprep.mubr.f32.mxu0 %v1789_v36  ;;  %1713 = vmatprep.mubr.f32.mxu1 %v316_v31  ;;  %v289_v41 = vmul.f32 %v273_v37, %v273_v37  ;;  %v319_v53 = vmul.f32 %v303_v45, %v271_v26  ;;  %v349_v31 = vld [vmem:[#allocation2 + $0x38] sm:$0xff] }
  0xba   :  { %v1791_v42 = vpop.eup %1790  ;;  %v318_v44 = vmul.f32 %v302_v38, %v270_v28  ;;  %v288_v46 = vmul.f32 %v272_v39, %v272_v39  ;;  %v2108_v28 = vld [vmem:[%s2641_s3] ss:$0 sm:$0xff]  ;;  %s1881_s3 = smov 124  }
  0xbb   :  { %v1793_v47 = vpop.eup %1792  ;;  %v275_v48 = vmul.f32 %v1791_v42, %v1791_v42  ;;  %v305_v51 = vmul.f32 %v289_v41, %v289_v41 }
  0xbc   :  { %1664 = vmatmul.mubr.f32.gmra.mxu0 %v1787_v30  ;;  %1714 = vmatmul.mubr.f32.gmra.mxu1 %v317_v43  ;;  %v304_v49 = vmul.f32 %v288_v46, %v288_v46  ;;  %v274_v50 = vmul.f32 %v1793_v47, %v1793_v47  ;;  %v538_v43 = vld [vmem:[#allocation3 + $0x10] sm:$0xff] }
  0xbd   :  { %1666 = vmatprep.mubr.f32.mxu0 %v1793_v47  ;;  %1716 = vmatprep.mubr.f32.mxu1 %v318_v44  ;;  %v291_v56 = vmul.f32 %v275_v48, %v275_v48  ;;  %v321_v61 = vmul.f32 %v305_v51, %v273_v37  ;;  %v541_v51 = vld [vmem:[#allocation3 + $0x28] sm:$0xff] }
  0xbe   :  { %v1795_v52 = vpop.eup %1794  ;;  %v320_v54 = vmul.f32 %v304_v49, %v272_v39  ;;  %v290_v55 = vmul.f32 %v274_v50, %v274_v50 }
  0xbf   :  { %v1797_v57 = vpop.eup %1796  ;;  %v277_v58 = vmul.f32 %v1795_v52, %v1795_v52  ;;  %v307_v63 = vmul.f32 %v291_v56, %v291_v56 }
  0xc0   :  { %1667 = vmatmul.mubr.f32.gmra.mxu0 %v1791_v42  ;;  %1717 = vmatmul.mubr.f32.gmra.mxu1 %v319_v53  ;;  %v306_v59 = vmul.f32 %v290_v55, %v290_v55  ;;  %v276_v60 = vmul.f32 %v1797_v57, %v1797_v57  ;;  %v348_v42 = vld [vmem:[#allocation2 + $0x30] sm:$0xff] }
  0xc1   :  { %1669 = vmatprep.mubr.f32.mxu0 %v1797_v57  ;;  %1719 = vmatprep.mubr.f32.mxu1 %v320_v54  ;;  %v293_v1 = vmul.f32 %v277_v58, %v277_v58  ;;  %v323_v3 = vmul.f32 %v307_v63, %v275_v48 }
  0xc2   :  { %v322_v62 = vmul.f32 %v306_v59, %v274_v50  ;;  %v292_v0 = vmul.f32 %v276_v60, %v276_v60  ;;  %v351_v50 = vld [vmem:[#allocation2 + $0x48] sm:$0xff] }
  0xc3   :  { %v309_v5 = vmul.f32 %v293_v1, %v293_v1 }
  0xc4   :  { %1670 = vmatmul.mubr.f32.gmra.mxu0 %v1795_v52  ;;  %1720 = vmatmul.mubr.f32.gmra.mxu1 %v321_v61  ;;  %v308_v2 = vmul.f32 %v292_v0, %v292_v0  ;;  %v350_v61 = vld [vmem:[#allocation2 + $0x40] sm:$0xff] }
  0xc5   :  { %1722 = vmatprep.mubr.f32.mxu1 %v322_v62  ;;  %v325_v6 = vmul.f32 %v309_v5, %v277_v58  ;;  %v540_v62 = vld [vmem:[#allocation3 + $0x20] sm:$0xff] }
  0xc6   :  { %v324_v4 = vmul.f32 %v308_v2, %v276_v60 }
  0xc8   :  { %1723 = vmatmul.mubr.f32.gmra.mxu1 %v323_v3 }
  0xc9   :  { %1725 = vmatprep.mubr.f32.mxu1 %v324_v4 }
  0xcc   :  { %1726 = vmatmul.mubr.f32.gmra.mxu1 %v325_v6  ;;  %v353_v6 = vld [vmem:[#allocation2 + $0x58] sm:$0xff] }
 0x168   :  { %v1650_v9 = vpop.f32.mrf.mxu0 }
 0x169   :  { %v504_v11 = vadd.f32 %v1650_v9, %v343_v8 }
 0x16a   :  { %v424_v12 = vpop.f32.mrf.mxu0 }
 0x16b   :  { %521 = vst.msk [vmem:[#allocation2 + $0x8] sm:$0xff] %vm43_vm0, %v504_v11  ;;  %v503_v14 = vadd.f32 %v424_v12, %v342_v10 }
 0x16c   :  { %v1653_v15 = vpop.f32.mrf.mxu0 }
 0x16d   :  { %520 = vst.msk [vmem:[#allocation2] sm:$0xff] %vm43_vm0, %v503_v14  ;;  %v506_v17 = vadd.f32 %v1653_v15, %v345_v13  ;;  %v352_v15 = vld [vmem:[#allocation2 + $0x50] sm:$0xff] }
 0x16e   :  { %v434_v18 = vpop.f32.mrf.mxu0 }
 0x16f   :  { %523 = vst.msk [vmem:[#allocation2 + $0x18] sm:$0xff] %vm43_vm0, %v506_v17  ;;  %v505_v20 = vadd.f32 %v434_v18, %v344_v16  ;;  %v542_v16 = vld [vmem:[#allocation3 + $0x30] sm:$0xff] }
 0x170   :  { %v1656_v22 = vpop.f32.mrf.mxu0  ;;  %v1706_v23 = vpop.f32.mrf.mxu1 }
 0x171   :  { %522 = vst.msk [vmem:[#allocation2 + $0x10] sm:$0xff] %vm43_vm0, %v505_v20  ;;  %v508_v26 = vadd.f32 %v1656_v22, %v347_v19  ;;  %v698_v27 = vadd.f32 %v1706_v23, %v537_v40 }
 0x172   :  { %v444_v29 = vpop.f32.mrf.mxu0  ;;  %v618_v30 = vpop.f32.mrf.mxu1  ;;  %v2110_v33 = vld [vmem:[#allocation2 + $0x8] sm:$0xff] }
 0x173   :  { %525 = vst.msk [vmem:[#allocation2 + $0x28] sm:$0xff] %vm43_vm0, %v508_v26  ;;  %714 = vst.msk [vmem:[#allocation3 + $0x8] sm:$0xff] %vm43_vm0, %v698_v27  ;;  %v507_v34 = vadd.f32 %v444_v29, %v346_v24  ;;  %v697_v36 = vadd.f32 %v618_v30, %v536_v25  ;;  %v797_v37 = vadd.f32 %v2102_v21, %v2110_v33  ;;  %v355_v24 = vld [vmem:[#allocation2 + $0x68] sm:$0xff] }
 0x174   :  { %v1659_v38 = vpop.f32.mrf.mxu0  ;;  %v1709_v39 = vpop.f32.mrf.mxu1  ;;  %v773_v41 = vadd.f32 %v2108_v28, %v2110_v33  ;;  %v2118_v44 = vld [vmem:[#allocation2] sm:$0xff]  ;;  %v545_v25 = vld [vmem:[#allocation3 + $0x48] sm:$0xff] }
 0x175   :  { %524 = vst.msk [vmem:[#allocation2 + $0x20] sm:$0xff] %vm43_vm0, %v507_v34  ;;  %713 = vst.msk [vmem:[#allocation3] sm:$0xff] %vm43_vm0, %v697_v36  ;;  %v510_v45 = vadd.f32 %v1659_v38, %v349_v31  ;;  %v700_v46 = vadd.f32 %v1709_v39, %v539_v32  ;;  %881 = vrot.lane.b32.xlu1 %v797_v37, %s1881_s3  ;;  %v772_v52 = vadd.f32 %v2108_v28, %v2118_v44  ;;  %v354_v38 = vld [vmem:[#allocation2 + $0x60] sm:$0xff] }
 0x176   :  { %v1302_v47 = vmul.f32 0.125, %v773_v41  ;;  %v454_v48 = vpop.f32.mrf.mxu0  ;;  %v628_v49 = vpop.f32.mrf.mxu1  ;;  %v2125_v53 = vld [vmem:[#allocation2 + $0x18] sm:$0xff]  ;;  %v796_v56 = vadd.f32 %v2102_v21, %v2118_v44  ;;  %v2186_v34 = vstv %s2133_s27  ;;  %v544_v39 = vld [vmem:[#allocation3 + $0x40] sm:$0xff] }
 0x177   :  { %527 = vst.msk [vmem:[#allocation2 + $0x38] sm:$0xff] %vm43_vm0, %v510_v45  ;;  %716 = vst.msk [vmem:[#allocation3 + $0x18] sm:$0xff] %vm43_vm0, %v700_v46  ;;  %v509_v54 = vadd.f32 %v454_v48, %v348_v42  ;;  %v699_v55 = vadd.f32 %v628_v49, %v538_v43  ;;  %v775_v57 = vadd.f32 %v2108_v28, %v2125_v53  ;;  %v1301_v60 = vmul.f32 0.125, %v772_v52  ;;  %v357_v49 = vld [vmem:[#allocation2 + $0x78] sm:$0xff] }
 0x178   :  { %1462 = vst.msk [vmem:[%s2645_s7 + $0x8] sm:$0xff] %vm911_vm2, %v1302_v47  ;;  %v1662_v58 = vpop.f32.mrf.mxu0  ;;  %v1712_v59 = vpop.f32.mrf.mxu1  ;;  %v2139_v63 = vld [vmem:[#allocation2 + $0x10] sm:$0xff]  ;;  %v799_v7 = vadd.f32 %v2102_v21, %v2125_v53  ;;  %v846_v42 = vadd.f32 %v2186_v34, %v2118_v44  ;;  %v547_v44 = vld [vmem:[#allocation3 + $0x58] sm:$0xff] }
 0x179   :  { %526 = vst.msk [vmem:[#allocation2 + $0x30] sm:$0xff] %vm43_vm0, %v509_v54  ;;  %715 = vst.msk [vmem:[#allocation3 + $0x10] sm:$0xff] %vm43_vm0, %v699_v55  ;;  %v512_v0 = vadd.f32 %v1662_v58, %v351_v50  ;;  %v702_v1 = vadd.f32 %v1712_v59, %v541_v51  ;;  %879 = vrot.lane.b32.xlu1 %v796_v56, %s1881_s3  ;;  %v1304_v2 = vmul.f32 0.125, %v775_v57 }
 0x17a   :  { %v774_v3 = vadd.f32 %v2108_v28, %v2139_v63  ;;  %1461 = vst.msk [vmem:[%s2645_s7] sm:$0xff] %vm911_vm2, %v1301_v60  ;;  %v464_v4 = vpop.f32.mrf.mxu0  ;;  %v638_v5 = vpop.f32.mrf.mxu1  ;;  %v2152_v8 = vld [vmem:[#allocation2 + $0x28] sm:$0xff]  ;;  %v798_v26 = vadd.f32 %v2102_v21, %v2139_v63  ;;  %v356_v60 = vld [vmem:[#allocation2 + $0x70] sm:$0xff]  ;;  %1798 = vrcp.f32 %v846_v42 }
 0x17b   :  { %529 = vst.msk [vmem:[#allocation2 + $0x48] sm:$0xff] %vm43_vm0, %v512_v0  ;;  %718 = vst.msk [vmem:[#allocation3 + $0x28] sm:$0xff] %vm43_vm0, %v702_v1  ;;  %v511_v9 = vadd.f32 %v464_v4, %v350_v61  ;;  %v701_v10 = vadd.f32 %v638_v5, %v540_v62  ;;  %v777_v12 = vadd.f32 %v2108_v28, %v2152_v8  ;;  %v546_v61 = vld [vmem:[#allocation3 + $0x50] sm:$0xff] }
 0x17c   :  { %1464 = vst.msk [vmem:[%s2645_s7 + $0x18] sm:$0xff] %vm911_vm2, %v1304_v2  ;;  %v1303_v11 = vmul.f32 0.125, %v774_v3  ;;  %v1665_v13 = vpop.f32.mrf.mxu0  ;;  %v1715_v14 = vpop.f32.mrf.mxu1  ;;  %v2162_v17 = vld [vmem:[#allocation2 + $0x20] sm:$0xff]  ;;  %v801_v56 = vadd.f32 %v2102_v21, %v2152_v8  ;;  %v848_v3 = vadd.f32 %v2186_v34, %v2139_v63 }
 0x17d   :  { %528 = vst.msk [vmem:[#allocation2 + $0x40] sm:$0xff] %vm43_vm0, %v511_v9  ;;  %717 = vst.msk [vmem:[#allocation3 + $0x20] sm:$0xff] %vm43_vm0, %v701_v10  ;;  %v514_v18 = vadd.f32 %v1665_v13, %v353_v6  ;;  %v704_v19 = vadd.f32 %v1715_v14, %v543_v35  ;;  %885 = vrot.lane.b32.xlu1 %v799_v7, %s1881_s3  ;;  %v1306_v40 = vmul.f32 0.125, %v777_v12  ;;  %v549_v35 = vld [vmem:[#allocation3 + $0x68] sm:$0xff] }
 0x17e   :  { %1463 = vst.msk [vmem:[%s2645_s7 + $0x10] sm:$0xff] %vm911_vm2, %v1303_v11  ;;  %v776_v20 = vadd.f32 %v2108_v28, %v2162_v17  ;;  %v474_v22 = vpop.f32.mrf.mxu0  ;;  %v648_v23 = vpop.f32.mrf.mxu1  ;;  %v2175_v27 = vld [vmem:[#allocation2 + $0x38] sm:$0xff]  ;;  %v800_v9 = vadd.f32 %v2102_v21, %v2162_v17  ;;  %1800 = vrcp.f32 %v848_v3 }
 0x17f   :  { %531 = vst.msk [vmem:[#allocation2 + $0x58] sm:$0xff] %vm43_vm0, %v514_v18  ;;  %720 = vst.msk [vmem:[#allocation3 + $0x38] sm:$0xff] %vm43_vm0, %v704_v19  ;;  %v513_v29 = vadd.f32 %v474_v22, %v352_v15  ;;  %v703_v30 = vadd.f32 %v648_v23, %v542_v16  ;;  %v779_v32 = vadd.f32 %v2108_v28, %v2175_v27  ;;  %v548_v16 = vld [vmem:[#allocation3 + $0x60] sm:$0xff] }
 0x180   :  { %1466 = vst.msk [vmem:[%s2645_s7 + $0x28] sm:$0xff] %vm911_vm2, %v1306_v40  ;;  %v1305_v31 = vmul.f32 0.125, %v776_v20  ;;  %v1668_v36 = vpop.f32.mrf.mxu0  ;;  %v1718_v37 = vpop.f32.mrf.mxu1  ;;  %v2188_v41 = vld [vmem:[#allocation2 + $0x30] sm:$0xff]  ;;  %v849_v22 = vadd.f32 %v2186_v34, %v2125_v53 }
 0x181   :  { %530 = vst.msk [vmem:[#allocation2 + $0x50] sm:$0xff] %vm43_vm0, %v513_v29  ;;  %719 = vst.msk [vmem:[#allocation3 + $0x30] sm:$0xff] %vm43_vm0, %v703_v30  ;;  %v516_v43 = vadd.f32 %v1668_v36, %v355_v24  ;;  %v706_v45 = vadd.f32 %v1718_v37, %v545_v25  ;;  %883 = vrot.lane.b32.xlu1 %v798_v26, %s1881_s3  ;;  %v778_v46 = vadd.f32 %v2108_v28, %v2188_v41  ;;  %v551_v24 = vld [vmem:[#allocation3 + $0x78] sm:$0xff]  ;;  %v550_v36 = vld [vmem:[#allocation3 + $0x70] sm:$0xff] }
 0x182   :  { %1465 = vst.msk [vmem:[%s2645_s7 + $0x20] sm:$0xff] %vm911_vm2, %v1305_v31  ;;  %v484_v47 = vpop.f32.mrf.mxu0  ;;  %v658_v48 = vpop.f32.mrf.mxu1  ;;  %v2201_v50 = vld [vmem:[#allocation2 + $0x48] sm:$0xff]  ;;  %v1308_v51 = vmul.f32 0.125, %v779_v32  ;;  %v802_v25 = vadd.f32 %v2102_v21, %v2188_v41  ;;  %1802 = vrcp.f32 %v849_v22  ;;  %v2357_v22 = vld [vmem:[#allocation3 + $0x10] sm:$0xff] }
 0x183   :  { %533 = vst.msk [vmem:[#allocation2 + $0x68] sm:$0xff] %vm43_vm0, %v516_v43  ;;  %722 = vst.msk [vmem:[#allocation3 + $0x48] sm:$0xff] %vm43_vm0, %v706_v45  ;;  %v515_v52 = vadd.f32 %v484_v47, %v354_v38  ;;  %v705_v54 = vadd.f32 %v658_v48, %v544_v39  ;;  %v805_v55 = vadd.f32 %v2102_v21, %v2201_v50  ;;  %v1307_v0 = vmul.f32 0.125, %v778_v46 }
 0x184   :  { %v1671_v57 = vpop.f32.mrf.mxu0  ;;  %v1721_v58 = vpop.f32.mrf.mxu1  ;;  %v781_v59 = vadd.f32 %v2108_v28, %v2201_v50  ;;  %v2211_v62 = vld [vmem:[#allocation2 + $0x40] sm:$0xff]  ;;  %1468 = vst.msk [vmem:[%s2645_s7 + $0x38] sm:$0xff] %vm911_vm2, %v1308_v51  ;;  %v851_v43 = vadd.f32 %v2186_v34, %v2152_v8  ;;  %v803_v46 = vadd.f32 %v2102_v21, %v2175_v27 }
 0x185   :  { %532 = vst.msk [vmem:[#allocation2 + $0x60] sm:$0xff] %vm43_vm0, %v515_v52  ;;  %721 = vst.msk [vmem:[#allocation3 + $0x40] sm:$0xff] %vm43_vm0, %v705_v54  ;;  %v518_v1 = vadd.f32 %v1671_v57, %v357_v49  ;;  %v708_v2 = vadd.f32 %v1721_v58, %v547_v44  ;;  %897 = vrot.lane.b32.xlu0 %v805_v55, %s1881_s3  ;;  %889 = vrot.lane.b32.xlu1 %v801_v56, %s1881_s3 }
 0x186   :  { %v1310_v4 = vmul.f32 0.125, %v781_v59  ;;  %v494_v5 = vpop.f32.mrf.mxu0  ;;  %v668_v6 = vpop.f32.mrf.mxu1  ;;  %v780_v7 = vadd.f32 %v2108_v28, %v2211_v62  ;;  %v2227_v10 = vld [vmem:[#allocation2 + $0x58] sm:$0xff]  ;;  %1467 = vst.msk [vmem:[%s2645_s7 + $0x30] sm:$0xff] %vm911_vm2, %v1307_v0  ;;  %v804_v12 = vadd.f32 %v2102_v21, %v2211_v62  ;;  %v847_v56 = vadd.f32 %v2186_v34, %v2110_v33 }
 0x187   :  { %535 = vst.msk [vmem:[#allocation2 + $0x78] sm:$0xff] %vm43_vm0, %v518_v1  ;;  %724 = vst.msk [vmem:[#allocation3 + $0x58] sm:$0xff] %vm43_vm0, %v708_v2  ;;  %v517_v63 = vadd.f32 %v494_v5, %v356_v60  ;;  %v707_v11 = vadd.f32 %v668_v6, %v546_v61  ;;  %v783_v13 = vadd.f32 %v2108_v28, %v2227_v10  ;;  %v1799_v55 = vpop.eup %1798  ;;  %1804 = vrcp.f32 %v851_v43 }
 0x188   :  { %1470 = vst.msk [vmem:[%s2645_s7 + $0x48] sm:$0xff] %vm911_vm2, %v1310_v4  ;;  %v1724_v14 = vpop.f32.mrf.mxu1  ;;  %v1309_v15 = vmul.f32 0.125, %v780_v7  ;;  %v2243_v18 = vld [vmem:[#allocation2 + $0x50] sm:$0xff]  ;;  %v807_v30 = vadd.f32 %v2102_v21, %v2227_v10  ;;  %v853_v57 = vadd.f32 %v2186_v34, %v2175_v27  ;;  %1806 = vrcp.f32 %v847_v56 }
 0x189   :  { %534 = vst.msk [vmem:[#allocation2 + $0x70] sm:$0xff] %vm43_vm0, %v517_v63  ;;  %723 = vst.msk [vmem:[#allocation3 + $0x50] sm:$0xff] %vm43_vm0, %v707_v11  ;;  %v710_v19 = vadd.f32 %v1724_v14, %v549_v35  ;;  %895 = vrot.lane.b32.xlu0 %v804_v12, %s1881_s3  ;;  %887 = vrot.lane.b32.xlu1 %v800_v9, %s1881_s3  ;;  %v1312_v40 = vmul.f32 0.125, %v783_v13  ;;  %v782_v20 = vadd.f32 %v2108_v28, %v2243_v18  ;;  %v2344_v12 = vld [vmem:[#allocation3 + $0x18] sm:$0xff] }
 0x18a   :  { %1469 = vst.msk [vmem:[%s2645_s7 + $0x40] sm:$0xff] %vm911_vm2, %v1309_v15  ;;  %v678_v23 = vpop.f32.mrf.mxu1  ;;  %v2259_v26 = vld [vmem:[#allocation2 + $0x68] sm:$0xff]  ;;  %v806_v49 = vadd.f32 %v2102_v21, %v2243_v18  ;;  %v850_v33 = vadd.f32 %v2186_v34, %v2162_v17  ;;  %v855_v60 = vadd.f32 %v2186_v34, %v2201_v50  ;;  %1808 = vrcp.f32 %v853_v57 }
 0x18b   :  { %726 = vst.msk [vmem:[#allocation3 + $0x68] sm:$0xff] %vm43_vm0, %v710_v19  ;;  %v709_v29 = vadd.f32 %v678_v23, %v548_v16  ;;  %v1311_v53 = vmul.f32 0.125, %v782_v20  ;;  %v785_v31 = vadd.f32 %v2108_v28, %v2259_v26  ;;  %v809_v58 = vadd.f32 %v2102_v21, %v2259_v26  ;;  %v1801_v27 = vpop.eup %1800  ;;  %v2349_v16 = vld [vmem:[#allocation3] sm:$0xff]  ;;  %v2351_v19 = vld [vmem:[#allocation3 + $0x28] sm:$0xff] }
 0x18c   :  { %1472 = vst.msk [vmem:[%s2645_s7 + $0x58] sm:$0xff] %vm911_vm2, %v1312_v40  ;;  %v1727_v32 = vpop.f32.mrf.mxu1  ;;  %v2270_v37 = vld [vmem:[#allocation2 + $0x60] sm:$0xff]  ;;  %1810 = vrcp.f32 %v850_v33  ;;  %v852_v0 = vadd.f32 %v2186_v34, %v2188_v41  ;;  %v857_v17 = vadd.f32 %v2186_v34, %v2227_v10  ;;  %v854_v50 = vadd.f32 %v2186_v34, %v2211_v62  ;;  %v2338_v62 = vld [vmem:[#allocation3 + $0x8] sm:$0xff] }
 0x18d   :  { %725 = vst.msk [vmem:[#allocation3 + $0x60] sm:$0xff] %vm43_vm0, %v709_v29  ;;  %v712_v38 = vadd.f32 %v1727_v32, %v551_v24  ;;  %901 = vrot.lane.b32.xlu0 %v807_v30, %s1881_s3  ;;  %891 = vrot.lane.b32.xlu1 %v802_v25, %s1881_s3  ;;  %v1314_v39 = vmul.f32 0.125, %v785_v31  ;;  %v784_v42 = vadd.f32 %v2108_v28, %v2270_v37  ;;  %1812 = vrcp.f32 %v855_v60  ;;  %v2359_v24 = vld [vmem:[#allocation3 + $0x38] sm:$0xff]  ;;  %v2365_v30 = vld [vmem:[#allocation3 + $0x20] sm:$0xff]  ;;  %v2367_v31 = vld [vmem:[#allocation3 + $0x48] sm:$0xff] }
 0x18e   :  { %1471 = vst.msk [vmem:[%s2645_s7 + $0x50] sm:$0xff] %vm911_vm2, %v1311_v53  ;;  %v688_v45 = vpop.f32.mrf.mxu1  ;;  %v749_v47 = vld [vmem:[#allocation2 + $0x78] sm:$0xff]  ;;  %v808_v61 = vadd.f32 %v2102_v21, %v2270_v37  ;;  %1814 = vrcp.f32 %v852_v0  ;;  %v859_v3 = vadd.f32 %v2186_v34, %v2259_v26  ;;  %v856_v5 = vadd.f32 %v2186_v34, %v2243_v18 }
 0x18f   :  { %728 = vst.msk [vmem:[#allocation3 + $0x78] sm:$0xff] %vm43_vm0, %v712_v38  ;;  %v711_v48 = vadd.f32 %v688_v45, %v550_v36  ;;  %v1313_v44 = vmul.f32 0.125, %v784_v42  ;;  %v787_v51 = vadd.f32 %v2108_v28, %v749_v47  ;;  %v1803_v1 = vpop.eup %1802  ;;  %1816 = vrcp.f32 %v857_v17  ;;  %v2373_v38 = vld [vmem:[#allocation3 + $0x30] sm:$0xff]  ;;  %v2375_v42 = vld [vmem:[#allocation3 + $0x58] sm:$0xff] }
 0x190   :  { %1474 = vst.msk [vmem:[%s2645_s7 + $0x68] sm:$0xff] %vm911_vm2, %v1314_v39  ;;  %v748_v8 = vld [vmem:[#allocation2 + $0x70] sm:$0xff]  ;;  %v811_v41 = vadd.f32 %v2102_v21, %v749_v47  ;;  %1818 = vrcp.f32 %v854_v50  ;;  %v861_v35 = vadd.f32 %v2186_v34, %v749_v47  ;;  %v813_v9 = vadd.f32 %v2108_v28, %v2338_v62  ;;  %v2382_v47 = vld [vmem:[#allocation3 + $0x40] sm:$0xff] }
 0x191   :  { %727 = vst.msk [vmem:[#allocation3 + $0x70] sm:$0xff] %vm43_vm0, %v711_v48  ;;  %899 = vrot.lane.b32.xlu0 %v806_v49, %s1881_s3  ;;  %893 = vrot.lane.b32.xlu1 %v803_v46, %s1881_s3  ;;  %v786_v52 = vadd.f32 %v2108_v28, %v748_v8  ;;  %v1316_v54 = vmul.f32 0.125, %v787_v51  ;;  %v810_v2 = vadd.f32 %v2102_v21, %v748_v8  ;;  %1820 = vrcp.f32 %v859_v3 }
 0x192   :  { %1473 = vst.msk [vmem:[%s2645_s7 + $0x60] sm:$0xff] %vm911_vm2, %v1313_v44  ;;  %1822 = vrcp.f32 %v856_v5  ;;  %v858_v63 = vadd.f32 %v2186_v34, %v2270_v37  ;;  %v860_v13 = vadd.f32 %v2186_v34, %v748_v8  ;;  %v815_v15 = vadd.f32 %v2108_v28, %v2344_v12  ;;  %v2384_v49 = vld [vmem:[#allocation3 + $0x68] sm:$0xff] }
 0x193   :  { %v1315_v59 = vmul.f32 0.125, %v786_v52  ;;  %1476 = vst.msk [vmem:[%s2645_s7 + $0x78] sm:$0xff] %vm911_vm2, %v1316_v54  ;;  %1824 = vrcp.f32 %v861_v35  ;;  %v812_v40 = vadd.f32 %v2108_v28, %v2349_v16  ;;  %v817_v34 = vadd.f32 %v2108_v28, %v2351_v19  ;;  %v2391_v52 = vld [vmem:[#allocation3 + $0x50] sm:$0xff] }
 0x194   :  { %v1805_v4 = vpop.eup %1804  ;;  %1826 = vrcp.f32 %v813_v9  ;;  %v814_v25 = vadd.f32 %v2108_v28, %v2357_v22  ;;  %v819_v29 = vadd.f32 %v2108_v28, %v2359_v24  ;;  %v816_v32 = vadd.f32 %v2108_v28, %v2365_v30  ;;  %v2401_v33 = vld [vmem:[#allocation3 + $0x60] sm:$0xff] }
 0x195   :  { %905 = vrot.lane.b32.xlu0 %v809_v58, %s1881_s3  ;;  %1111 = vperm.xlu1 %1764, %v1799_v55   ;;  %1475 = vst.msk [vmem:[%s2645_s7 + $0x70] sm:$0xff] %vm911_vm2, %v1315_v59  ;;  %v1807_v6 = vpop.eup %1806  ;;  %1828 = vrcp.f32 %v858_v63  ;;  %v821_v37 = vadd.f32 %v2108_v28, %v2367_v31  ;;  %v818_v43 = vadd.f32 %v2108_v28, %v2373_v38 }
 0x196   :  { %1830 = vrcp.f32 %v860_v13  ;;  %v823_v46 = vadd.f32 %v2108_v28, %v2375_v42  ;;  %v820_v44 = vadd.f32 %v2108_v28, %v2382_v47  ;;  %v825_v8 = vadd.f32 %v2108_v28, %v2384_v49  ;;  %v2393_v55 = vld [vmem:[#allocation3 + $0x78] sm:$0xff] }
 0x197   :  { %v1809_v7 = vpop.eup %1808  ;;  %1832 = vrcp.f32 %v815_v15  ;;  %v822_v56 = vadd.f32 %v2108_v28, %v2391_v52  ;;  %v827_v58 = vadd.f32 %v2108_v28, %v2393_v55  ;;  %v824_v60 = vadd.f32 %v2108_v28, %v2401_v33 }
 0x198   :  { %1834 = vrcp.f32 %v812_v40  ;;  %v2407_v0 = vld [vmem:[#allocation3 + $0x70] sm:$0xff] }
 0x199   :  { %903 = vrot.lane.b32.xlu0 %v808_v61, %s1881_s3  ;;  %1121 = vperm.xlu1 %1764, %v1801_v27   ;;  %v1811_v10 = vpop.eup %1810  ;;  %1836 = vrcp.f32 %v817_v34  ;;  %v826_v17 = vadd.f32 %v2108_v28, %v2407_v0 }
 0x19a   :  { %v1813_v11 = vpop.eup %1812  ;;  %1838 = vrcp.f32 %v814_v25 }
 0x19b   :  { %v1815_v14 = vpop.eup %1814  ;;  %1840 = vrcp.f32 %v819_v29 }
 0x19c   :  { %v1817_v18 = vpop.eup %1816  ;;  %1842 = vrcp.f32 %v816_v32 }
 0x19d   :  { %907 = vrot.lane.b32.xlu0 %v810_v2, %s1881_s3  ;;  %1126 = vperm.xlu1 %1764, %v1803_v1   ;;  %v1819_v20 = vpop.eup %1818  ;;  %1844 = vrcp.f32 %v821_v37 }
 0x19e   :  { %v1821_v23 = vpop.eup %1820  ;;  %1846 = vrcp.f32 %v818_v43 }
 0x19f   :  { %v1823_v26 = vpop.eup %1822  ;;  %1848 = vrcp.f32 %v823_v46 }
 0x1a0   :  { %v1825_v53 = vpop.eup %1824  ;;  %1850 = vrcp.f32 %v820_v44 }
 0x1a1   :  { %909 = vrot.lane.b32.xlu0 %v811_v41, %s1881_s3  ;;  %1136 = vperm.xlu1 %1764, %v1805_v4   ;;  %v1827_v36 = vpop.eup %1826  ;;  %1852 = vrcp.f32 %v825_v8 }
 0x1a2   :  { %v1829_v39 = vpop.eup %1828  ;;  %1854 = vrcp.f32 %v822_v56 }
 0x1a3   :  { %v1831_v45 = vpop.eup %1830  ;;  %1856 = vrcp.f32 %v827_v58 }
 0x1a4   :  { %v1833_v48 = vpop.eup %1832  ;;  %1858 = vrcp.f32 %v824_v60 }
 0x1a5   :  { %1116 = vperm.xlu0 %1765, %v1807_v6   ;;  %1146 = vperm.xlu1 %1764, %v1809_v7   ;;  %v1835_v51 = vpop.eup %1834  ;;  %1860 = vrcp.f32 %v826_v17 }
 0x1a6   :  { %v1837_v54 = vpop.eup %1836 }
 0x1a7   :  { %v1839_v57 = vpop.eup %1838 }
 0x1a8   :  { %v1841_v59 = vpop.eup %1840 }
 0x1a9   :  { %1131 = vperm.xlu0 %1765, %v1811_v10   ;;  %1156 = vperm.xlu1 %1764, %v1813_v11   ;;  %v1843_v27 = vpop.eup %1842 }
 0x1aa   :  { %v1845_v61 = vpop.eup %1844 }
 0x1ab   :  { %v1847_v1 = vpop.eup %1846 }
 0x1ac   :  { %v1849_v2 = vpop.eup %1848 }
 0x1ad   :  { %1141 = vperm.xlu0 %1765, %v1815_v14   ;;  %1166 = vperm.xlu1 %1764, %v1817_v18   ;;  %v1851_v50 = vpop.eup %1850 }
 0x1ae   :  { %v1853_v3 = vpop.eup %1852 }
 0x1af   :  { %v1855_v41 = vpop.eup %1854 }
 0x1b0   :  { %v1857_v4 = vpop.eup %1856 }
 0x1b1   :  { %1151 = vperm.xlu0 %1765, %v1819_v20   ;;  %1176 = vperm.xlu1 %1764, %v1821_v23   ;;  %v1859_v5 = vpop.eup %1858 }
 0x1b2   :  { %v1861_v28 = vpop.eup %1860 }
 0x1b5   :  { %1161 = vperm.xlu0 %1765, %v1823_v26   ;;  %1186 = vperm.xlu1 %1764, %v1825_v53  }
 0x1b9   :  { %1171 = vperm.xlu0 %1765, %v1829_v39   ;;  %1239 = vrot.lane.b32.xlu1 %v1827_v36, %s1878_s22 }
 0x1bd   :  { %1181 = vperm.xlu0 %1765, %v1831_v45   ;;  %1243 = vrot.lane.b32.xlu1 %v1833_v48, %s1878_s22 }
 0x1c1   :  { %1237 = vrot.lane.b32.xlu0 %v1835_v51, %s1878_s22  ;;  %1247 = vrot.lane.b32.xlu1 %v1837_v54, %s1878_s22 }
 0x1c5   :  { %1241 = vrot.lane.b32.xlu0 %v1839_v57, %s1878_s22  ;;  %1251 = vrot.lane.b32.xlu1 %v1841_v59, %s1878_s22 }
 0x1c9   :  { %1245 = vrot.lane.b32.xlu0 %v1843_v27, %s1878_s22  ;;  %1255 = vrot.lane.b32.xlu1 %v1845_v61, %s1878_s22 }
 0x1cd   :  { %1249 = vrot.lane.b32.xlu0 %v1847_v1, %s1878_s22  ;;  %1259 = vrot.lane.b32.xlu1 %v1849_v2, %s1878_s22 }
 0x1d1   :  { %1253 = vrot.lane.b32.xlu0 %v1851_v50, %s1878_s22  ;;  %1263 = vrot.lane.b32.xlu1 %v1853_v3, %s1878_s22 }
 0x1d5   :  { %1257 = vrot.lane.b32.xlu0 %v1855_v41, %s1878_s22  ;;  %1267 = vrot.lane.b32.xlu1 %v1857_v4, %s1878_s22 }
 0x1d9   :  { %1261 = vrot.lane.b32.xlu0 %v1859_v5, %s1878_s22 }
 0x1dd   :  { %1265 = vrot.lane.b32.xlu0 %v1861_v28, %s1878_s22 }
 0x1e7   :  { %v882_v6 = vpop.permute.xlu1 %881 }
 0x1eb   :  { %v880_v35 = vpop.permute.xlu1 %879 }
 0x1ec   :  { %1730 = vmatprep.mubr.msk.f32.mxu0 %vm911_vm2, %v880_v35 }
 0x1ed   :  { %1731 = vmatmul.mubr.msk.f32.vlgmr.msra.gmra.mxu0 %vm911_vm2, %v882_v6 }
 0x1ef   :  { %v886_v7 = vpop.permute.xlu1 %885 }
 0x1f3   :  { %v884_v9 = vpop.permute.xlu1 %883 }
 0x1f4   :  { %1733 = vmatprep.mubr.msk.f32.mxu0 %vm911_vm2, %v884_v9 }
 0x1f5   :  { %1734 = vmatmul.mubr.msk.f32.gmra.mxu0 %vm911_vm2, %v886_v7 }
 0x1f7   :  { %v898_v10 = vpop.permute.xlu0 %897  ;;  %v890_v63 = vpop.permute.xlu1 %889 }
 0x1fb   :  { %v896_v11 = vpop.permute.xlu0 %895  ;;  %v888_v13 = vpop.permute.xlu1 %887 }
 0x1fc   :  { %1736 = vmatprep.mubr.msk.f32.mxu0 %vm911_vm2, %v888_v13  ;;  %1742 = vmatprep.mubr.msk.f32.mxu1 %vm911_vm2, %v896_v11 }
 0x1fd   :  { %1737 = vmatmul.mubr.msk.f32.gmra.mxu0 %vm911_vm2, %v890_v63  ;;  %1743 = vmatmul.mubr.msk.f32.vlgmr.msra.gmra.mxu1 %vm911_vm2, %v898_v10 }
 0x1ff   :  { %v902_v14 = vpop.permute.xlu0 %901  ;;  %v892_v15 = vpop.permute.xlu1 %891 }
 0x200   :  { %1739 = vmatprep.mubr.msk.f32.mxu0 %vm911_vm2, %v892_v15 }
 0x203   :  { %v900_v18 = vpop.permute.xlu0 %899  ;;  %v894_v40 = vpop.permute.xlu1 %893 }
 0x204   :  { %1740 = vmatmul.mubr.msk.f32.gmra.mxu0 %vm911_vm2, %v894_v40  ;;  %1745 = vmatprep.mubr.msk.f32.mxu1 %vm911_vm2, %v900_v18 }
 0x205   :  { %1746 = vmatmul.mubr.msk.f32.gmra.mxu1 %vm911_vm2, %v902_v14 }
 0x207   :  { %v906_v20 = vpop.permute.xlu0 %905 }
 0x20b   :  { %v904_v34 = vpop.permute.xlu0 %903 }
 0x20c   :  { %1748 = vmatprep.mubr.msk.f32.mxu1 %vm911_vm2, %v904_v34 }
 0x20d   :  { %1749 = vmatmul.mubr.msk.f32.gmra.mxu1 %vm911_vm2, %v906_v20 }
 0x20f   :  { %v908_v23 = vpop.permute.xlu0 %907 }
 0x210   :  { %1751 = vmatprep.mubr.msk.f32.mxu1 %vm911_vm2, %v908_v23  ;;  %v1112_v26 = vpop.permute.xlu1 %1111 }
 0x213   :  { %v910_v25 = vpop.permute.xlu0 %909 }
 0x214   :  { %1752 = vmatmul.mubr.msk.f32.gmra.mxu1 %vm911_vm2, %v910_v25  ;;  %v1122_v29 = vpop.permute.xlu1 %1121 }
 0x218   :  { %v1127_v53 = vpop.permute.xlu1 %1126 }
 0x21c   :  { %v1137_v43 = vpop.permute.xlu1 %1136 }
 0x220   :  { %v1117_v32 = vpop.permute.xlu0 %1116  ;;  %v1147_v44 = vpop.permute.xlu1 %1146 }
 0x224   :  { %v1132_v46 = vpop.permute.xlu0 %1131  ;;  %v1157_v57 = vpop.permute.xlu1 %1156 }
 0x228   :  { %v1142_v54 = vpop.permute.xlu0 %1141  ;;  %v1167_v41 = vpop.permute.xlu1 %1166 }
 0x22c   :  { %v1152_v27 = vpop.permute.xlu0 %1151  ;;  %v1177_v63 = vpop.permute.xlu1 %1176 }
 0x230   :  { %v1162_v35 = vpop.permute.xlu0 %1161  ;;  %v1187_v40 = vpop.permute.xlu1 %1186 }
 0x234   :  { %v1172_v14 = vpop.permute.xlu0 %1171 }
 0x238   :  { %v1182_v23 = vpop.permute.xlu0 %1181 }
 0x2ad   :  { %v1732_v36 = vpop.f32.mrf.mxu0 }
 0x2ae   :  { %v1190_v37 = vmul.f32 %v1732_v36, %v1117_v32 }
 0x2af   :  { %v1014_v39 = vpop.f32.mrf.mxu0 }
 0x2b0   :  { %1478 = vst.msk [vmem:[%s2645_s7 + $0x88] sm:$0xff] %vm911_vm2, %v1190_v37  ;;  %v1189_v45 = vmul.f32 %v1112_v26, %v1014_v39  ;;  %1335 = vrot.lane.b32.xlu1 %v1190_v37, %s1878_s22 }
 0x2b2   :  { %1477 = vst.msk [vmem:[%s2645_s7 + $0x80] sm:$0xff] %vm911_vm2, %v1189_v45  ;;  %1333 = vrot.lane.b32.xlu0 %v1189_v45, %s1878_s22 }
 0x2b5   :  { %v1735_v48 = vpop.f32.mrf.mxu0 }
 0x2b6   :  { %v1192_v51 = vmul.f32 %v1735_v48, %v1127_v53  ;;  %v1238_v53 = vpop.permute.xlu0 %1237 }
 0x2b7   :  { %v1024_v8 = vpop.f32.mrf.mxu0 }
 0x2b8   :  { %1480 = vst.msk [vmem:[%s2645_s7 + $0x98] sm:$0xff] %vm911_vm2, %v1192_v51  ;;  %v1191_v56 = vmul.f32 %v1122_v29, %v1024_v8  ;;  %1339 = vrot.lane.b32.xlu1 %v1192_v51, %s1878_s22  ;;  %v1240_v29 = vpop.permute.xlu1 %1239 }
 0x2ba   :  { %1479 = vst.msk [vmem:[%s2645_s7 + $0x90] sm:$0xff] %vm911_vm2, %v1191_v56  ;;  %1337 = vrot.lane.b32.xlu0 %v1191_v56, %s1878_s22  ;;  %v1242_v36 = vpop.permute.xlu0 %1241 }
 0x2bc   :  { %v1244_v32 = vpop.permute.xlu1 %1243 }
 0x2bd   :  { %v1738_v58 = vpop.f32.mrf.mxu0  ;;  %v1744_v59 = vpop.f32.mrf.mxu1 }
 0x2be   :  { %v1194_v60 = vmul.f32 %v1738_v58, %v1137_v43  ;;  %v1198_v61 = vmul.f32 %v1744_v59, %v1157_v57  ;;  %v1246_v39 = vpop.permute.xlu0 %1245  ;;  %v829_v57 = vadd.f32 %v2102_v21, %v2338_v62  ;;  %v830_v62 = vadd.f32 %v2102_v21, %v2357_v22 }
 0x2bf   :  { %v1034_v1 = vpop.f32.mrf.mxu0  ;;  %v1054_v17 = vpop.f32.mrf.mxu1 }
 0x2c0   :  { %1482 = vst.msk [vmem:[%s2645_s7 + $0xa8] sm:$0xff] %vm911_vm2, %v1194_v60  ;;  %1486 = vst.msk [vmem:[%s2645_s7 + $0xc8] sm:$0xff] %vm911_vm2, %v1198_v61  ;;  %v1193_v2 = vmul.f32 %v1132_v46, %v1034_v1  ;;  %v1197_v50 = vmul.f32 %v1152_v27, %v1054_v17  ;;  %1343 = vrot.lane.b32.xlu1 %v1194_v60, %s1878_s22  ;;  %v1248_v37 = vpop.permute.xlu1 %1247  ;;  %v1286_v59 = vmul.f32 %v1240_v29, %v829_v57 }
 0x2c1   :  { %v828_v27 = vadd.f32 %v2102_v21, %v2349_v16 }
 0x2c2   :  { %1481 = vst.msk [vmem:[%s2645_s7 + $0xa0] sm:$0xff] %vm911_vm2, %v1193_v2  ;;  %1485 = vst.msk [vmem:[%s2645_s7 + $0xc0] sm:$0xff] %vm911_vm2, %v1197_v50  ;;  %1341 = vrot.lane.b32.xlu0 %v1193_v2, %s1878_s22  ;;  %v1250_v45 = vpop.permute.xlu0 %1249 }
 0x2c4   :  { %v1741_v3 = vpop.f32.mrf.mxu0  ;;  %v1252_v43 = vpop.permute.xlu1 %1251 }
 0x2c5   :  { %v1196_v4 = vmul.f32 %v1741_v3, %v1147_v44  ;;  %v1747_v5 = vpop.f32.mrf.mxu1 }
 0x2c6   :  { %v1200_v28 = vmul.f32 %v1747_v5, %v1167_v41  ;;  %v1044_v6 = vpop.f32.mrf.mxu0  ;;  %v1254_v48 = vpop.permute.xlu0 %1253 }
 0x2c7   :  { %1484 = vst.msk [vmem:[%s2645_s7 + $0xb8] sm:$0xff] %vm911_vm2, %v1196_v4  ;;  %v1195_v7 = vmul.f32 %v1142_v54, %v1044_v6  ;;  %v1064_v9 = vpop.f32.mrf.mxu1  ;;  %1347 = vrot.lane.b32.xlu1 %v1196_v4, %s1878_s22  ;;  %v1287_v4 = vmul.f32 %v1242_v36, %v830_v62  ;;  %v833_v6 = vadd.f32 %v2102_v21, %v2351_v19 }
 0x2c8   :  { %1488 = vst.msk [vmem:[%s2645_s7 + $0xd8] sm:$0xff] %vm911_vm2, %v1200_v28  ;;  %v1199_v10 = vmul.f32 %v1162_v35, %v1064_v9  ;;  %v1256_v46 = vpop.permute.xlu1 %1255  ;;  %v834_v19 = vadd.f32 %v2102_v21, %v2373_v38  ;;  %v841_v36 = vadd.f32 %v2102_v21, %v2384_v49 }
 0x2c9   :  { %1483 = vst.msk [vmem:[%s2645_s7 + $0xb0] sm:$0xff] %vm911_vm2, %v1195_v7  ;;  %1345 = vrot.lane.b32.xlu0 %v1195_v7, %s1878_s22  ;;  %v1290_v35 = vmul.f32 %v1248_v37, %v833_v6 }
 0x2ca   :  { %1487 = vst.msk [vmem:[%s2645_s7 + $0xd0] sm:$0xff] %vm911_vm2, %v1199_v10  ;;  %v1258_v51 = vpop.permute.xlu0 %1257 }
 0x2cb   :  { %1351 = vrot.lane.b32.xlu1 %v1198_v61, %s1878_s22  ;;  %v1285_v61 = vmul.f32 %v1238_v53, %v828_v27  ;;  %v838_v53 = vadd.f32 %v2102_v21, %v2391_v52 }
 0x2cc   :  { %v1260_v44 = vpop.permute.xlu1 %1259 }
 0x2cd   :  { %v1750_v11 = vpop.f32.mrf.mxu1  ;;  %1349 = vrot.lane.b32.xlu0 %v1197_v50, %s1878_s22  ;;  %v831_v50 = vadd.f32 %v2102_v21, %v2344_v12  ;;  %v832_v12 = vadd.f32 %v2102_v21, %v2365_v30  ;;  %v837_v30 = vadd.f32 %v2102_v21, %v2367_v31  ;;  %v1295_v37 = vmul.f32 %v1258_v51, %v838_v53 }
 0x2ce   :  { %v1202_v13 = vmul.f32 %v1750_v11, %v1177_v63  ;;  %v2517_v54 = vpop.permute.xlu0 %1261  ;;  %v835_v11 = vadd.f32 %v2102_v21, %v2359_v24 }
 0x2cf   :  { %v1074_v15 = vpop.f32.mrf.mxu1  ;;  %1355 = vrot.lane.b32.xlu1 %v1200_v28, %s1878_s22  ;;  %v1288_v3 = vmul.f32 %v1244_v32, %v831_v50  ;;  %v1289_v9 = vmul.f32 %v1246_v39, %v832_v12 }
 0x2d0   :  { %1490 = vst.msk [vmem:[%s2645_s7 + $0xe8] sm:$0xff] %vm911_vm2, %v1202_v13  ;;  %v1201_v18 = vmul.f32 %v1172_v14, %v1074_v15  ;;  %v1264_v8 = vpop.permute.xlu1 %1263  ;;  %v1291_v15 = vmul.f32 %v1250_v45, %v834_v19  ;;  %v840_v45 = vadd.f32 %v2102_v21, %v2401_v33 }
 0x2d1   :  { %1353 = vrot.lane.b32.xlu0 %v1199_v10, %s1878_s22 }
 0x2d2   :  { %1489 = vst.msk [vmem:[%s2645_s7 + $0xe0] sm:$0xff] %vm911_vm2, %v1201_v18  ;;  %v2523_v58 = vpop.permute.xlu0 %1265 }
 0x2d3   :  { %1359 = vrot.lane.b32.xlu1 %v1202_v13, %s1878_s22  ;;  %v1292_v13 = vmul.f32 %v1252_v43, %v835_v11  ;;  %v1298_v43 = vmul.f32 %v1264_v8, %v841_v36  ;;  %v842_v8 = vadd.f32 %v2102_v21, %v2407_v0 }
 0x2d4   :  { %v1753_v20 = vpop.f32.mrf.mxu1  ;;  %v2519_v56 = vpop.permute.xlu1 %1267 }
 0x2d5   :  { %v1204_v34 = vmul.f32 %v1753_v20, %v1187_v40  ;;  %1357 = vrot.lane.b32.xlu0 %v1201_v18, %s1878_s22  ;;  %v1294_v20 = vmul.f32 %v1256_v46, %v837_v30  ;;  %v1299_v27 = vmul.f32 %v2523_v58, %v842_v8 }
 0x2d6   :  { %v1084_v25 = vpop.f32.mrf.mxu1 }
 0x2d7   :  { %1492 = vst.msk [vmem:[%s2645_s7 + $0xf8] sm:$0xff] %vm911_vm2, %v1204_v34  ;;  %v1203_v26 = vmul.f32 %v1182_v23, %v1084_v25  ;;  %1363 = vrot.lane.b32.xlu1 %v1204_v34, %s1878_s22  ;;  %v836_v34 = vadd.f32 %v2102_v21, %v2382_v47  ;;  %v839_v25 = vadd.f32 %v2102_v21, %v2375_v42 }
 0x2d9   :  { %1491 = vst.msk [vmem:[%s2645_s7 + $0xf0] sm:$0xff] %vm911_vm2, %v1203_v26  ;;  %1361 = vrot.lane.b32.xlu0 %v1203_v26, %s1878_s22  ;;  %v1293_v26 = vmul.f32 %v1254_v48, %v836_v34  ;;  %v1296_v31 = vmul.f32 %v1260_v44, %v839_v25  ;;  %v843_v48 = vadd.f32 %v2102_v21, %v2393_v55 }
 0x2da   :  { %v1297_v44 = vmul.f32 %v2517_v54, %v840_v45 }
 0x2db   :  { %v1300_v51 = vmul.f32 %v2519_v56, %v843_v48 }
 0x322   :  { %v1336_v60 = vpop.permute.xlu1 %1335 }
 0x323   :  { %v1382_v1 = vsub.f32 %v1286_v59, %v1336_v60 }
 0x324   :  { %v1334_v17 = vpop.permute.xlu0 %1333 }
 0x325   :  { %v1381_v2 = vsub.f32 %v1285_v61, %v1334_v17  ;;  %1415 = vrot.lane.b32.xlu1 %v1382_v1, %s1881_s3 }
 0x327   :  { %1413 = vrot.lane.b32.xlu0 %v1381_v2, %s1881_s3 }
 0x32a   :  { %v1340_v41 = vpop.permute.xlu1 %1339 }
 0x32b   :  { %v1384_v5 = vsub.f32 %v1288_v3, %v1340_v41 }
 0x32c   :  { %v1338_v16 = vpop.permute.xlu0 %1337 }
 0x32d   :  { %v1383_v28 = vsub.f32 %v1287_v4, %v1338_v16  ;;  %1419 = vrot.lane.b32.xlu1 %v1384_v5, %s1881_s3 }
 0x32f   :  { %1417 = vrot.lane.b32.xlu0 %v1383_v28, %s1881_s3 }
 0x332   :  { %v1344_v7 = vpop.permute.xlu1 %1343 }
 0x333   :  { %v1386_v10 = vsub.f32 %v1290_v35, %v1344_v7 }
 0x334   :  { %v1342_v22 = vpop.permute.xlu0 %1341 }
 0x335   :  { %v1385_v63 = vsub.f32 %v1289_v9, %v1342_v22  ;;  %1423 = vrot.lane.b32.xlu1 %v1386_v10, %s1881_s3 }
 0x337   :  { %1421 = vrot.lane.b32.xlu0 %v1385_v63, %s1881_s3 }
 0x339   :  { %v1348_v14 = vpop.permute.xlu1 %1347 }
 0x33a   :  { %v1388_v18 = vsub.f32 %v1292_v13, %v1348_v14 }
 0x33b   :  { %v1346_v40 = vpop.permute.xlu0 %1345 }
 0x33c   :  { %v1387_v23 = vsub.f32 %v1291_v15, %v1346_v40  ;;  %1427 = vrot.lane.b32.xlu1 %v1388_v18, %s1881_s3 }
 0x33d   :  { %v1352_v24 = vpop.permute.xlu1 %1351 }
 0x33e   :  { %v1390_v38 = vsub.f32 %v1294_v20, %v1352_v24  ;;  %1425 = vrot.lane.b32.xlu0 %v1387_v23, %s1881_s3 }
 0x33f   :  { %v1350_v29 = vpop.permute.xlu0 %1349 }
 0x340   :  { %v1389_v32 = vsub.f32 %v1293_v26, %v1350_v29  ;;  %1431 = vrot.lane.b32.xlu1 %v1390_v38, %s1881_s3 }
 0x341   :  { %v1356_v47 = vpop.permute.xlu1 %1355 }
 0x342   :  { %v1392_v39 = vsub.f32 %v1296_v31, %v1356_v47  ;;  %1429 = vrot.lane.b32.xlu0 %v1389_v32, %s1881_s3 }
 0x343   :  { %v1354_v42 = vpop.permute.xlu0 %1353 }
 0x344   :  { %v1391_v46 = vsub.f32 %v1295_v37, %v1354_v42  ;;  %1435 = vrot.lane.b32.xlu1 %v1392_v39, %s1881_s3 }
 0x345   :  { %v1360_v52 = vpop.permute.xlu1 %1359 }
 0x346   :  { %v1394_v57 = vsub.f32 %v1298_v43, %v1360_v52  ;;  %1433 = vrot.lane.b32.xlu0 %v1391_v46, %s1881_s3 }
 0x347   :  { %v1358_v49 = vpop.permute.xlu0 %1357 }
 0x348   :  { %v1393_v59 = vsub.f32 %v1297_v44, %v1358_v49  ;;  %1439 = vrot.lane.b32.xlu1 %v1394_v57, %s1881_s3 }
 0x349   :  { %v1364_v33 = vpop.permute.xlu1 %1363 }
 0x34a   :  { %v1396_v60 = vsub.f32 %v1300_v51, %v1364_v33  ;;  %1437 = vrot.lane.b32.xlu0 %v1393_v59, %s1881_s3 }
 0x34b   :  { %v1362_v55 = vpop.permute.xlu0 %1361 }
 0x34c   :  { %v1395_v54 = vsub.f32 %v1299_v27, %v1362_v55  ;;  %1443 = vrot.lane.b32.xlu1 %v1396_v60, %s1881_s3 }
 0x34e   :  { %1441 = vrot.lane.b32.xlu0 %v1395_v54, %s1881_s3 }
 0x397   :  { %v1416_v61 = vpop.permute.xlu1 %1415 }
 0x398   :  { %1494 = vst.msk [vmem:[%s2645_s7 + $0x108] sm:$0xff] %vm911_vm2, %v1416_v61 }
 0x399   :  { %v1414_v21 = vpop.permute.xlu0 %1413 }
 0x39a   :  { %1493 = vst.msk [vmem:[%s2645_s7 + $0x100] sm:$0xff] %vm911_vm2, %v1414_v21 }
 0x39f   :  { %v1420_v0 = vpop.permute.xlu1 %1419 }
 0x3a0   :  { %1496 = vst.msk [vmem:[%s2645_s7 + $0x118] sm:$0xff] %vm911_vm2, %v1420_v0 }
 0x3a1   :  { %v1418_v56 = vpop.permute.xlu0 %1417 }
 0x3a2   :  { %1495 = vst.msk [vmem:[%s2645_s7 + $0x110] sm:$0xff] %vm911_vm2, %v1418_v56 }
 0x3a7   :  { %v1424_v58 = vpop.permute.xlu1 %1423 }
 0x3a8   :  { %1498 = vst.msk [vmem:[%s2645_s7 + $0x128] sm:$0xff] %vm911_vm2, %v1424_v58 }
 0x3a9   :  { %v1422_v1 = vpop.permute.xlu0 %1421 }
 0x3aa   :  { %1497 = vst.msk [vmem:[%s2645_s7 + $0x120] sm:$0xff] %vm911_vm2, %v1422_v1 }
 0x3ae   :  { %v1428_v17 = vpop.permute.xlu1 %1427 }
 0x3af   :  { %1500 = vst.msk [vmem:[%s2645_s7 + $0x138] sm:$0xff] %vm911_vm2, %v1428_v17 }
 0x3b0   :  { %v1426_v2 = vpop.permute.xlu0 %1425 }
 0x3b1   :  { %1499 = vst.msk [vmem:[%s2645_s7 + $0x130] sm:$0xff] %vm911_vm2, %v1426_v2 }
 0x3b2   :  { %v1432_v50 = vpop.permute.xlu1 %1431 }
 0x3b3   :  { %1502 = vst.msk [vmem:[%s2645_s7 + $0x148] sm:$0xff] %vm911_vm2, %v1432_v50 }
 0x3b4   :  { %v1430_v3 = vpop.permute.xlu0 %1429 }
 0x3b5   :  { %1501 = vst.msk [vmem:[%s2645_s7 + $0x140] sm:$0xff] %vm911_vm2, %v1430_v3 }
 0x3b6   :  { %v1436_v62 = vpop.permute.xlu1 %1435 }
 0x3b7   :  { %1504 = vst.msk [vmem:[%s2645_s7 + $0x158] sm:$0xff] %vm911_vm2, %v1436_v62 }
 0x3b8   :  { %v1434_v41 = vpop.permute.xlu0 %1433 }
 0x3b9   :  { %1503 = vst.msk [vmem:[%s2645_s7 + $0x150] sm:$0xff] %vm911_vm2, %v1434_v41 }
 0x3ba   :  { %v1440_v4 = vpop.permute.xlu1 %1439 }
 0x3bb   :  { %1506 = vst.msk [vmem:[%s2645_s7 + $0x168] sm:$0xff] %vm911_vm2, %v1440_v4 }
 0x3bc   :  { %v1438_v5 = vpop.permute.xlu0 %1437 }
 0x3bd   :  { %1505 = vst.msk [vmem:[%s2645_s7 + $0x160] sm:$0xff] %vm911_vm2, %v1438_v5 }
 0x3be   :  { %v1444_v16 = vpop.permute.xlu1 %1443 }
 0x3bf   :  { %1508 = vst.msk [vmem:[%s2645_s7 + $0x178] sm:$0xff] %vm911_vm2, %v1444_v16 }
 0x3c0   :  { %v1442_v28 = vpop.permute.xlu0 %1441 }
 0x3c1   :  { %1507 = vst.msk [vmem:[%s2645_s7 + $0x170] sm:$0xff] %vm911_vm2, %v1442_v28 }
 0x3c2   :  { %1513 = vsyncpa [#allocation5], 1 }

</bundles_post_ra>
